<compile_context>
chip_gen: v7x
topology: tpu7x:2x2x1
jax: 0.10.0
libtpu: 0.0.40
codegen_flags: <defaults>
</compile_context>

<pallas_src>
import functools
import math

import jax
import jax.numpy as jnp
from jax import lax
from jax.experimental import pallas as pl
from jax.experimental.pallas import tpu as pltpu

LN_EPS = 1e-12  # BertLayerNorm(..., eps=1e-12) in BertSelfOutput / BertOutput
BF16 = jnp.bfloat16
_MIB = 1024 * 1024

# "NT" matmul: contract last dim of a with last dim of b (no explicit transpose).
_NT_DIMS = (((1,), (1,)), ((), ()))


def _layernorm(x, w, b):
    # BertLayerNorm: biased variance over last dim, f32 math, rsqrt on EUP.
    u = jnp.mean(x, axis=-1, keepdims=True)
    s = jnp.mean((x - u) * (x - u), axis=-1, keepdims=True)
    return (x - u) * lax.rsqrt(s + LN_EPS) * w + b


# ------------------------------ fused BertLayer kernel ------------------------
def _bert_layer_kernel(hid_ref, mask_ref,
                       wqkv_ref, bqkv_ref, wo_ref, bo_ref, ln1w_ref, ln1b_ref,
                       wi_ref, bi_ref, wo2_ref, bo2_ref, ln2w_ref, ln2b_ref,
                       *rest, nh, hd, with_pooler):
    if with_pooler:
        wp_ref, bp_ref, out_ref, pooled_ref = rest[:4]
        qkv_sc, ctx_sc, x1_sc, x1b_sc, ff_sc = rest[4:]
    else:
        out_ref = rest[0]
        qkv_sc, ctx_sc, x1_sc, x1b_sc, ff_sc = rest[1:]

    k_idx = pl.program_id(1)
    nk = pl.num_programs(1)
    H = nh * hd
    scale = 1.0 / math.sqrt(hd)

    # -------- phase 1 (k == 0): attention + BertSelfOutput + LayerNorm1 --------
    @pl.when(k_idx == 0)
    def _():
        x = hid_ref[0]                                 # (S, H) f32
        xb = x.astype(BF16)
        mask = mask_ref[0]                             # (1, S) additive mask

        # Fused full-width QKV projection: one (S,H)@(H,3H) matmul, N=3H.
        qkv = jnp.dot(xb, wqkv_ref[...],
                      preferred_element_type=jnp.float32) + bqkv_ref[...]
        qkv_sc[...] = qkv.astype(BF16)

        # Per-head score/context matmuls (inherently narrow); context written at
        # the head's column offset so the output projection runs as one K=H dot.
        # Per-iteration state lives in refs, so the static unroll does not carry
        # live values across heads.
        for h in range(nh):
            q_h = qkv_sc[:, h * hd:(h + 1) * hd]               # (S, hd) bf16
            k_h = qkv_sc[:, H + h * hd:H + (h + 1) * hd]
            v_h = qkv_sc[:, 2 * H + h * hd:2 * H + (h + 1) * hd]

            s = lax.dot_general(q_h, k_h, _NT_DIMS,
                                preferred_element_type=jnp.float32) * scale
            s = s + mask
            s = s - jnp.max(s, axis=-1, keepdims=True)
            e = jnp.exp(s)
            probs = e * pl.reciprocal(jnp.sum(e, axis=-1, keepdims=True),
                                      approx=True)
            ctx_sc[:, h * hd:(h + 1) * hd] = jnp.dot(
                probs.astype(BF16), v_h,
                preferred_element_type=jnp.float32).astype(BF16)

        # Single K=H output projection with the original Wo.
        attn = jnp.dot(ctx_sc[...], wo_ref[...],
                       preferred_element_type=jnp.float32) + bo_ref[...]
        x1 = _layernorm(attn + x, ln1w_ref[...], ln1b_ref[...])
        x1_sc[...] = x1
        x1b_sc[...] = x1.astype(BF16)                 # cached bf16 copy for the FFN

    # -------- phase 2 (every k): one K-chunk of the relu FFN -------------------
    inter = jnp.dot(x1b_sc[...], wi_ref[...],
                    preferred_element_type=jnp.float32) + bi_ref[...]
    inter = jnp.maximum(inter, 0.0)                    # relu (config.hidden_act)
    chunk = jnp.dot(inter.astype(BF16), wo2_ref[...],
                    preferred_element_type=jnp.float32)

    @pl.when(k_idx == 0)
    def _():
        ff_sc[...] = chunk

    @pl.when(k_idx > 0)
    def _():
        ff_sc[...] += chunk

    # -------- phase 3 (k == last): bias, residual, LayerNorm2 (+ pooler) -------
    @pl.when(k_idx == nk - 1)
    def _():
        ff = ff_sc[...] + bo2_ref[...]
        x2 = _layernorm(ff + x1_sc[...], ln2w_ref[...], ln2b_ref[...])
        out_ref[0] = x2
        if with_pooler:
            first = x2[0:1, :].astype(BF16)            # first token only
            pooled_ref[0] = jnp.tanh(
                jnp.dot(first, wp_ref[...],
                        preferred_element_type=jnp.float32) + bp_ref[...])


# ------------------------------ planning helpers ------------------------------
def _vmem_plan():
    cap = 64 * _MIB  # conservative fallback (safe on every generation)
    try:
        info = pltpu.get_tpu_info()
        cap = int(getattr(info, 'vmem_capacity_bytes', cap)) or cap
    except Exception:
        pass
    cap = max(cap, 64 * _MIB)
    vmem_limit = max(min(cap * 7 // 8, 112 * _MIB), 48 * _MIB)
    budget = vmem_limit - 8 * _MIB
    return int(vmem_limit), int(budget)


def _estimate_layer_vmem(S, H, tk, with_pooler):
    f32, b16, db = 4, 2, 2                               # db = default double-buffering
    io = db * (2 * S * H + S) * f32                      # hidden in/out blocks + mask
    attn_w = db * ((3 * H * H + H * H) * b16 + 10 * H * f32)
    ffn_w = db * (2 * H * tk * b16 + (tk + 3 * H) * f32)
    scratch = 18 * S * H                                 # qkv/ctx/x1/x1b/ff scratches
    values = 2 * S * max(S, 3 * H) * f32                 # in-kernel temporaries headroom
    pool = db * (H * H * b16 + H * f32) if with_pooler else 0
    return io + attn_w + ffn_w + scratch + values + pool


def _pick_ffn_chunk(S, H, I, budget, with_pooler):
    # Prefer fully-resident FFN weights (fetched once per layer).
    if _estimate_layer_vmem(S, H, I, with_pooler) <= budget:
        return I
    for tk in (2048, 1536, 1024, 768, 512, 384, 256, 128):
        if I % tk == 0 and _estimate_layer_vmem(S, H, tk, with_pooler) <= budget:
            return tk
    for tk in (512, 384, 256, 128):
        if I % tk == 0:
            return tk
    return I


def _const_spec(arr):
    n = arr.ndim
    return pl.BlockSpec(arr.shape, lambda b, k, n=n: (0,) * n)


# ------------------------------ parameter prep (hoisted) ----------------------
def _prepare_layer_params(p):
    return {
        'wqkv': jnp.concatenate([p['wq'], p['wk'], p['wv']], axis=1).astype(BF16),
        'bqkv': jnp.concatenate([p['bq'], p['bk'], p['bv']], axis=1).astype(jnp.float32),
        'wo': p['wo'].astype(BF16), 'bo': p['bo'],
        'ln1w': p['ln1w'], 'ln1b': p['ln1b'],
        'wi': p['wi'].astype(BF16), 'bi': p['bi'],
        'wo2': p['wo2'].astype(BF16), 'bo2': p['bo2'],
        'ln2w': p['ln2w'], 'ln2b': p['ln2b'],
    }


def prepare_params(layer_params, pooler_params):
    prep_layers = [_prepare_layer_params(p) for p in layer_params]
    prep_pooler = {'wp': pooler_params['wp'].astype(BF16),
                   'bp': pooler_params['bp'].astype(jnp.float32)}
    return prep_layers, prep_pooler


# ------------------------------ layer wrapper ----------------------------------
def bert_layer_pallas(x, add_mask, prep, nh, pooler_prep=None):
    B, S, H = x.shape
    hd = H // nh
    I = prep['wi'].shape[1]
    with_pooler = pooler_prep is not None

    vmem_limit, budget = _vmem_plan()
    tk = _pick_ffn_chunk(S, H, I, budget, with_pooler)
    nk = I // tk
    resident_ffn = (nk == 1)

    kernel = functools.partial(_bert_layer_kernel, nh=nh, hd=hd,
                               with_pooler=with_pooler)

    if resident_ffn:
        wi_spec, bi_spec, wo2_spec = (_const_spec(prep['wi']),
                                      _const_spec(prep['bi']),
                                      _const_spec(prep['wo2']))
    else:
        wi_spec = pl.BlockSpec((H, tk), lambda b, k: (0, k))
        bi_spec = pl.BlockSpec((1, tk), lambda b, k: (0, k))
        wo2_spec = pl.BlockSpec((tk, H), lambda b, k: (k, 0))

    in_specs = [
        pl.BlockSpec((1, S, H), lambda b, k: (b, 0, 0)),   # hidden states
        pl.BlockSpec((1, 1, S), lambda b, k: (b, 0, 0)),   # additive mask
        _const_spec(prep['wqkv']), _const_spec(prep['bqkv']),
        _const_spec(prep['wo']), _const_spec(prep['bo']),
        _const_spec(prep['ln1w']), _const_spec(prep['ln1b']),
        wi_spec, bi_spec, wo2_spec,
        _const_spec(prep['bo2']),
        _const_spec(prep['ln2w']), _const_spec(prep['ln2b']),
    ]
    args = [x, add_mask, prep['wqkv'], prep['bqkv'], prep['wo'], prep['bo'],
            prep['ln1w'], prep['ln1b'], prep['wi'], prep['bi'], prep['wo2'],
            prep['bo2'], prep['ln2w'], prep['ln2b']]

    out_shapes = [jax.ShapeDtypeStruct((B, S, H), jnp.float32)]
    out_specs = [pl.BlockSpec((1, S, H), lambda b, k: (b, 0, 0))]
    if with_pooler:
        in_specs += [_const_spec(pooler_prep['wp']), _const_spec(pooler_prep['bp'])]
        args += [pooler_prep['wp'], pooler_prep['bp']]
        out_shapes.append(jax.ShapeDtypeStruct((B, 1, H), jnp.float32))
        out_specs.append(pl.BlockSpec((1, 1, H), lambda b, k: (b, 0, 0)))

    scratch_shapes = [
        pltpu.VMEM((S, 3 * H), BF16),        # fused QKV projections
        pltpu.VMEM((S, H), BF16),            # per-head contexts (concat layout)
        pltpu.VMEM((S, H), jnp.float32),     # x1 (post-LN1), persists over k
        pltpu.VMEM((S, H), BF16),            # bf16 copy of x1 for FFN matmuls
        pltpu.VMEM((S, H), jnp.float32),     # FFN accumulator
    ]

    outs = pl.pallas_call(
        kernel,
        grid=(B, nk),
        in_specs=in_specs,
        out_specs=tuple(out_specs) if with_pooler else out_specs[0],
        out_shape=tuple(out_shapes) if with_pooler else out_shapes[0],
        scratch_shapes=scratch_shapes,
        compiler_params=pltpu.CompilerParams(
            dimension_semantics=("parallel", "arbitrary"),
            vmem_limit_bytes=vmem_limit),
    )(*args)

    if with_pooler:
        out, pooled = outs
        return out, pooled[:, 0, :]
    return outs, None


# ------------------------------ full forward ------------------------------------
def my_transformer_pallas(embedding_output, attention_mask, prep_layers, prep_pooler, nh):
    """Reproduces MyTransformer.forward with output_all_encoded_layers=False."""
    # extended_attention_mask = (1 - mask[:, None, None, :]) * -10000
    B, S = attention_mask.shape
    add_mask = ((1.0 - attention_mask.astype(jnp.float32)) * -10000.0).reshape(B, 1, S)

    h = embedding_output
    pooled = None
    n = len(prep_layers)
    for li, prep in enumerate(prep_layers):
        is_last = (li == n - 1)
        h, p = bert_layer_pallas(h, add_mask, prep, nh,
                                 pooler_prep=prep_pooler if is_last else None)
        if is_last:
            pooled = p
    return h, pooled


# ------------------------- pure-JAX reference -------------------------------
# Mirrors the kernel's bf16-at-MXU / f32-accumulate dtype strategy so the check
# is tight; semantics otherwise follow the PyTorch module exactly.
def _reference(embedding_output, attention_mask, layer_params, pooler_params, nh):
    B, S = attention_mask.shape
    H = embedding_output.shape[-1]
    hd = H // nh
    scale = 1.0 / math.sqrt(hd)
    add_mask = ((1.0 - attention_mask.astype(jnp.float32)) * -10000.0)[:, None, None, :]
    h = embedding_output
    for p in layer_params:
        xb = h.astype(BF16)
        q = jnp.dot(xb, p['wq'].astype(BF16), preferred_element_type=jnp.float32) + p['bq']
        k = jnp.dot(xb, p['wk'].astype(BF16), preferred_element_type=jnp.float32) + p['bk']
        v = jnp.dot(xb, p['wv'].astype(BF16), preferred_element_type=jnp.float32) + p['bv']

        def split(t):
            return t.reshape(B, S, nh, hd).transpose(0, 2, 1, 3)

        qh, kh, vh = split(q), split(k), split(v)
        s = jnp.einsum('bhqd,bhkd->bhqk', qh.astype(BF16), kh.astype(BF16),
                       preferred_element_type=jnp.float32) * scale + add_mask
        s = s - jnp.max(s, axis=-1, keepdims=True)
        e = jnp.exp(s)
        probs = e / jnp.sum(e, axis=-1, keepdims=True)
        ctx = jnp.einsum('bhqk,bhkd->bhqd', probs.astype(BF16), vh.astype(BF16),
                         preferred_element_type=jnp.float32)
        ctx = ctx.transpose(0, 2, 1, 3).reshape(B, S, H)
        attn = jnp.dot(ctx.astype(BF16), p['wo'].astype(BF16),
                       preferred_element_type=jnp.float32) + p['bo']
        x1 = _layernorm(attn + h, p['ln1w'], p['ln1b'])
        inter = jnp.maximum(
            jnp.dot(x1.astype(BF16), p['wi'].astype(BF16),
                    preferred_element_type=jnp.float32) + p['bi'], 0.0)
        ff = jnp.dot(inter.astype(BF16), p['wo2'].astype(BF16),
                     preferred_element_type=jnp.float32) + p['bo2']
        h = _layernorm(ff + x1, p['ln2w'], p['ln2b'])
    x0 = h[:, 0, :]
    pooled = jnp.tanh(
        jnp.dot(x0.astype(BF16), pooler_params['wp'].astype(BF16),
                preferred_element_type=jnp.float32) + pooler_params['bp'])
    return h, pooled


# ------------------------------ main ----------------------------------------
if __name__ == "__main__":
    # Small config consistent with MyTransformer(dim, num_attention_heads, num_hidden_layers).
    B, S = 2, 8
    H = 32                 # dim
    NH = 4                 # num_attention_heads
    NL = 2                 # num_hidden_layers
    I = 3072               # Config.intermediate_size (not overridden by MyTransformer)

    key = jax.random.PRNGKey(0)

    def nrm(k, shape, scale=0.02):
        return (scale * jax.random.normal(k, shape)).astype(jnp.float32)

    layer_params = []
    for _ in range(NL):
        keys = jax.random.split(key, 13)
        key = keys[-1]
        p = {
            'wq': nrm(keys[0], (H, H)), 'bq': nrm(keys[1], (1, H)),
            'wk': nrm(keys[2], (H, H)), 'bk': nrm(keys[3], (1, H)),
            'wv': nrm(keys[4], (H, H)), 'bv': nrm(keys[5], (1, H)),
            'wo': nrm(keys[6], (H, H)), 'bo': nrm(keys[7], (1, H)),
            'ln1w': jnp.ones((1, H), jnp.float32), 'ln1b': jnp.zeros((1, H), jnp.float32),
            'wi': nrm(keys[8], (H, I)), 'bi': nrm(keys[9], (1, I)),
            'wo2': nrm(keys[10], (I, H)), 'bo2': nrm(keys[11], (1, H)),
            'ln2w': jnp.ones((1, H), jnp.float32), 'ln2b': jnp.zeros((1, H), jnp.float32),
        }
        layer_params.append(p)

    k1, k2, k3, key = jax.random.split(key, 4)
    pooler_params = {'wp': nrm(k1, (H, H)), 'bp': nrm(k2, (1, H))}

    embedding_output = jax.random.normal(k3, (B, S, H), dtype=jnp.float32)
    # Attention mask: 1 = attend, last two positions of batch 1 masked out.
    attention_mask = jnp.ones((B, S), dtype=jnp.float32).at[1, -2:].set(0.0)

    # Weight preparation is done once, outside the forward pass.
    prep_layers, prep_pooler = prepare_params(layer_params, pooler_params)

    encoded, pooled = my_transformer_pallas(
        embedding_output, attention_mask, prep_layers, prep_pooler, NH)
    encoded = jax.block_until_ready(encoded)
    pooled = jax.block_until_ready(pooled)

    ref_enc, ref_pool = _reference(
        embedding_output, attention_mask, layer_params, pooler_params, NH)

    assert encoded.shape == (B, S, H) and pooled.shape == (B, H)
    assert jnp.allclose(encoded, ref_enc, atol=1e-3, rtol=1e-3)
    assert jnp.allclose(pooled, ref_pool, atol=1e-3, rtol=1e-3)

    print("KERNEL_OK")
</pallas_src>

<mosaic_0001>
module attributes {stable_mosaic.version = 11 : i64} {
  func.func @_bert_layer_kernel(%arg0: i32, %arg1: i32, %arg2: memref<1x8x32xf32, #tpu.memory_space<vmem>>, %arg3: memref<1x1x8xf32, #tpu.memory_space<vmem>>, %arg4: memref<32x96xbf16, #tpu.memory_space<vmem>>, %arg5: memref<1x96xf32, #tpu.memory_space<vmem>>, %arg6: memref<32x32xbf16, #tpu.memory_space<vmem>>, %arg7: memref<1x32xf32, #tpu.memory_space<vmem>>, %arg8: memref<1x32xf32, #tpu.memory_space<vmem>>, %arg9: memref<1x32xf32, #tpu.memory_space<vmem>>, %arg10: memref<32x3072xbf16, #tpu.memory_space<vmem>>, %arg11: memref<1x3072xf32, #tpu.memory_space<vmem>>, %arg12: memref<3072x32xbf16, #tpu.memory_space<vmem>>, %arg13: memref<1x32xf32, #tpu.memory_space<vmem>>, %arg14: memref<1x32xf32, #tpu.memory_space<vmem>>, %arg15: memref<1x32xf32, #tpu.memory_space<vmem>>, %arg16: memref<1x8x32xf32, #tpu.memory_space<vmem>>, %arg17: memref<8x96xbf16, #tpu.memory_space<vmem>>, %arg18: memref<8x32xbf16, #tpu.memory_space<vmem>>, %arg19: memref<8x32xf32, #tpu.memory_space<vmem>>, %arg20: memref<8x32xbf16, #tpu.memory_space<vmem>>, %arg21: memref<8x32xf32, #tpu.memory_space<vmem>>) attributes {dimension_semantics = [#tpu.dimension_semantics<parallel>, #tpu.dimension_semantics<arbitrary>], iteration_bounds = array<i64: 2, 1>, scalar_prefetch = 0 : i64, scratch_operands = 5 : i64, tpu.core_type = #tpu.core_type<tc>, window_params = [{transform_indices = @transform_0, window_bounds = array<i64: 1, 8, 32>}, {transform_indices = @transform_1, window_bounds = array<i64: 1, 1, 8>}, {pipeline_mode = #tpu.pipeline_mode<synchronous>, transform_indices = @transform_2, window_bounds = array<i64: 32, 96>}, {pipeline_mode = #tpu.pipeline_mode<synchronous>, transform_indices = @transform_3, window_bounds = array<i64: 1, 96>}, {pipeline_mode = #tpu.pipeline_mode<synchronous>, transform_indices = @transform_4, window_bounds = array<i64: 32, 32>}, {pipeline_mode = #tpu.pipeline_mode<synchronous>, transform_indices = @transform_5, window_bounds = array<i64: 1, 32>}, {pipeline_mode = #tpu.pipeline_mode<synchronous>, transform_indices = @transform_6, window_bounds = array<i64: 1, 32>}, {pipeline_mode = #tpu.pipeline_mode<synchronous>, transform_indices = @transform_7, window_bounds = array<i64: 1, 32>}, {pipeline_mode = #tpu.pipeline_mode<synchronous>, transform_indices = @transform_8, window_bounds = array<i64: 32, 3072>}, {pipeline_mode = #tpu.pipeline_mode<synchronous>, transform_indices = @transform_9, window_bounds = array<i64: 1, 3072>}, {pipeline_mode = #tpu.pipeline_mode<synchronous>, transform_indices = @transform_10, window_bounds = array<i64: 3072, 32>}, {pipeline_mode = #tpu.pipeline_mode<synchronous>, transform_indices = @transform_11, window_bounds = array<i64: 1, 32>}, {pipeline_mode = #tpu.pipeline_mode<synchronous>, transform_indices = @transform_12, window_bounds = array<i64: 1, 32>}, {pipeline_mode = #tpu.pipeline_mode<synchronous>, transform_indices = @transform_13, window_bounds = array<i64: 1, 32>}, {transform_indices = @transform_14, window_bounds = array<i64: 1, 8, 32>}]} {
    %c0_i32 = arith.constant 0 : i32
    %0 = arith.cmpi eq, %arg1, %c0_i32 : i32
    %1 = arith.extui %0 : i1 to i32
    %c0_i32_0 = arith.constant 0 : i32
    %2 = arith.cmpi ne, %1, %c0_i32_0 : i32
    scf.if %2 {
      %c0_16 = arith.constant 0 : index
      %c0_17 = arith.constant 0 : index
      %c0_18 = arith.constant 0 : index
      %23 = vector.load %arg2[%c0_16, %c0_17, %c0_18] : memref<1x8x32xf32, #tpu.memory_space<vmem>>, vector<1x8x32xf32>
      %24 = vector.shape_cast %23 : vector<1x8x32xf32> to vector<8x32xf32>
      %25 = arith.truncf %24 : vector<8x32xf32> to vector<8x32xbf16>
      %c0_19 = arith.constant 0 : index
      %c0_20 = arith.constant 0 : index
      %c0_21 = arith.constant 0 : index
      %26 = vector.load %arg3[%c0_19, %c0_20, %c0_21] : memref<1x1x8xf32, #tpu.memory_space<vmem>>, vector<1x1x8xf32>
      %27 = vector.shape_cast %26 : vector<1x1x8xf32> to vector<1x8xf32>
      %c0_22 = arith.constant 0 : index
      %c0_23 = arith.constant 0 : index
      %28 = vector.load %arg4[%c0_22, %c0_23] : memref<32x96xbf16, #tpu.memory_space<vmem>>, vector<32x96xbf16>
      %cst_24 = arith.constant dense<0.000000e+00> : vector<8x96xf32>
      %29 = tpu.matmul %25, %28, %cst_24 {dimension_numbers = #tpu.dot_dimension_numbers<[1], [0], [0], [1], [0, 0, 1, 1], [], []>} : vector<8x32xbf16>, vector<32x96xbf16>, vector<8x96xf32> -> vector<8x96xf32>
      %c0_25 = arith.constant 0 : index
      %c0_26 = arith.constant 0 : index
      %30 = vector.load %arg5[%c0_25, %c0_26] : memref<1x96xf32, #tpu.memory_space<vmem>>, vector<1x96xf32>
      %31 = vector.broadcast %30 : vector<1x96xf32> to vector<8x96xf32>
      %32 = arith.addf %29, %31 : vector<8x96xf32>
      %33 = arith.truncf %32 : vector<8x96xf32> to vector<8x96xbf16>
      %c0_27 = arith.constant 0 : index
      %c0_28 = arith.constant 0 : index
      %34 = vector.load %arg17[%c0_27, %c0_28] : memref<8x96xbf16, #tpu.memory_space<vmem>>, vector<8x96xbf16>
      tpu.vector_store %arg17[%c0_27, %c0_28], %33 {strides = array<i32>} : memref<8x96xbf16, #tpu.memory_space<vmem>>, vector<8x96xbf16>,
      %c0_29 = arith.constant 0 : index
      %c0_30 = arith.constant 0 : index
      %35 = vector.load %arg17[%c0_29, %c0_30] : memref<8x96xbf16, #tpu.memory_space<vmem>>, vector<8x8xbf16>
      %c0_31 = arith.constant 0 : index
      %c32 = arith.constant 32 : index
      %36 = vector.load %arg17[%c0_31, %c32] : memref<8x96xbf16, #tpu.memory_space<vmem>>, vector<8x8xbf16>
      %c0_32 = arith.constant 0 : index
      %c64 = arith.constant 64 : index
      %37 = vector.load %arg17[%c0_32, %c64] : memref<8x96xbf16, #tpu.memory_space<vmem>>, vector<8x8xbf16>
      %cst_33 = arith.constant dense<0.000000e+00> : vector<8x8xf32>
      %38 = tpu.matmul %35, %36, %cst_33 {dimension_numbers = #tpu.dot_dimension_numbers<[1], [1], [0], [0], [0, 0, 1, 0], [], []>} : vector<8x8xbf16>, vector<8x8xbf16>, vector<8x8xf32> -> vector<8x8xf32>
      %cst_34 = arith.constant 0.353553385 : f32
      %39 = vector.broadcast %cst_34 : f32 to vector<8x8xf32>
      %40 = arith.mulf %38, %39 : vector<8x8xf32>
      %41 = vector.broadcast %27 : vector<1x8xf32> to vector<8x8xf32>
      %42 = arith.addf %40, %41 : vector<8x8xf32>
      %cst_35 = arith.constant dense<0xFF800000> : vector<8xf32>
      %43 = vector.multi_reduction <maximumf>, %42, %cst_35 [1] : vector<8x8xf32> to vector<8xf32>
      %44 = vector.shape_cast %43 : vector<8xf32> to vector<8x1xf32>
      %45 = vector.broadcast %44 : vector<8x1xf32> to vector<8x8xf32>
      %46 = arith.subf %42, %45 : vector<8x8xf32>
      %47 = math.exp %46 : vector<8x8xf32>
      %cst_36 = arith.constant dense<0.000000e+00> : vector<8xf32>
      %48 = vector.multi_reduction <add>, %47, %cst_36 [1] : vector<8x8xf32> to vector<8xf32>
      %49 = vector.shape_cast %48 : vector<8xf32> to vector<8x1xf32>
      %50 = tpu.reciprocal %49 {approx = true} : vector<8x1xf32> -> vector<8x1xf32>
      %51 = vector.broadcast %50 : vector<8x1xf32> to vector<8x8xf32>
      %52 = arith.mulf %47, %51 : vector<8x8xf32>
      %53 = arith.truncf %52 : vector<8x8xf32> to vector<8x8xbf16>
      %cst_37 = arith.constant dense<0.000000e+00> : vector<8x8xf32>
      %54 = tpu.matmul %53, %37, %cst_37 {dimension_numbers = #tpu.dot_dimension_numbers<[1], [0], [0], [1], [0, 0, 1, 1], [], []>} : vector<8x8xbf16>, vector<8x8xbf16>, vector<8x8xf32> -> vector<8x8xf32>
      %55 = arith.truncf %54 : vector<8x8xf32> to vector<8x8xbf16>
      %c0_38 = arith.constant 0 : index
      %c0_39 = arith.constant 0 : index
      %56 = vector.load %arg18[%c0_38, %c0_39] : memref<8x32xbf16, #tpu.memory_space<vmem>>, vector<8x8xbf16>
      tpu.vector_store %arg18[%c0_38, %c0_39], %55 {strides = array<i32>} : memref<8x32xbf16, #tpu.memory_space<vmem>>, vector<8x8xbf16>,
      %c0_40 = arith.constant 0 : index
      %c8 = arith.constant 8 : index
      %57 = vector.load %arg17[%c0_40, %c8] : memref<8x96xbf16, #tpu.memory_space<vmem>>, vector<8x8xbf16>
      %c0_41 = arith.constant 0 : index
      %c40 = arith.constant 40 : index
      %58 = vector.load %arg17[%c0_41, %c40] : memref<8x96xbf16, #tpu.memory_space<vmem>>, vector<8x8xbf16>
      %c0_42 = arith.constant 0 : index
      %c72 = arith.constant 72 : index
      %59 = vector.load %arg17[%c0_42, %c72] : memref<8x96xbf16, #tpu.memory_space<vmem>>, vector<8x8xbf16>
      %cst_43 = arith.constant dense<0.000000e+00> : vector<8x8xf32>
      %60 = tpu.matmul %57, %58, %cst_43 {dimension_numbers = #tpu.dot_dimension_numbers<[1], [1], [0], [0], [0, 0, 1, 0], [], []>} : vector<8x8xbf16>, vector<8x8xbf16>, vector<8x8xf32> -> vector<8x8xf32>
      %cst_44 = arith.constant 0.353553385 : f32
      %61 = vector.broadcast %cst_44 : f32 to vector<8x8xf32>
      %62 = arith.mulf %60, %61 : vector<8x8xf32>
      %63 = vector.broadcast %27 : vector<1x8xf32> to vector<8x8xf32>
      %64 = arith.addf %62, %63 : vector<8x8xf32>
      %cst_45 = arith.constant dense<0xFF800000> : vector<8xf32>
      %65 = vector.multi_reduction <maximumf>, %64, %cst_45 [1] : vector<8x8xf32> to vector<8xf32>
      %66 = vector.shape_cast %65 : vector<8xf32> to vector<8x1xf32>
      %67 = vector.broadcast %66 : vector<8x1xf32> to vector<8x8xf32>
      %68 = arith.subf %64, %67 : vector<8x8xf32>
      %69 = math.exp %68 : vector<8x8xf32>
      %cst_46 = arith.constant dense<0.000000e+00> : vector<8xf32>
      %70 = vector.multi_reduction <add>, %69, %cst_46 [1] : vector<8x8xf32> to vector<8xf32>
      %71 = vector.shape_cast %70 : vector<8xf32> to vector<8x1xf32>
      %72 = tpu.reciprocal %71 {approx = true} : vector<8x1xf32> -> vector<8x1xf32>
      %73 = vector.broadcast %72 : vector<8x1xf32> to vector<8x8xf32>
      %74 = arith.mulf %69, %73 : vector<8x8xf32>
      %75 = arith.truncf %74 : vector<8x8xf32> to vector<8x8xbf16>
      %cst_47 = arith.constant dense<0.000000e+00> : vector<8x8xf32>
      %76 = tpu.matmul %75, %59, %cst_47 {dimension_numbers = #tpu.dot_dimension_numbers<[1], [0], [0], [1], [0, 0, 1, 1], [], []>} : vector<8x8xbf16>, vector<8x8xbf16>, vector<8x8xf32> -> vector<8x8xf32>
      %77 = arith.truncf %76 : vector<8x8xf32> to vector<8x8xbf16>
      %c0_48 = arith.constant 0 : index
      %c8_49 = arith.constant 8 : index
      %78 = vector.load %arg18[%c0_48, %c8_49] : memref<8x32xbf16, #tpu.memory_space<vmem>>, vector<8x8xbf16>
      tpu.vector_store %arg18[%c0_48, %c8_49], %77 {strides = array<i32>} : memref<8x32xbf16, #tpu.memory_space<vmem>>, vector<8x8xbf16>,
      %c0_50 = arith.constant 0 : index
      %c16 = arith.constant 16 : index
      %79 = vector.load %arg17[%c0_50, %c16] : memref<8x96xbf16, #tpu.memory_space<vmem>>, vector<8x8xbf16>
      %c0_51 = arith.constant 0 : index
      %c48 = arith.constant 48 : index
      %80 = vector.load %arg17[%c0_51, %c48] : memref<8x96xbf16, #tpu.memory_space<vmem>>, vector<8x8xbf16>
      %c0_52 = arith.constant 0 : index
      %c80 = arith.constant 80 : index
      %81 = vector.load %arg17[%c0_52, %c80] : memref<8x96xbf16, #tpu.memory_space<vmem>>, vector<8x8xbf16>
      %cst_53 = arith.constant dense<0.000000e+00> : vector<8x8xf32>
      %82 = tpu.matmul %79, %80, %cst_53 {dimension_numbers = #tpu.dot_dimension_numbers<[1], [1], [0], [0], [0, 0, 1, 0], [], []>} : vector<8x8xbf16>, vector<8x8xbf16>, vector<8x8xf32> -> vector<8x8xf32>
      %cst_54 = arith.constant 0.353553385 : f32
      %83 = vector.broadcast %cst_54 : f32 to vector<8x8xf32>
      %84 = arith.mulf %82, %83 : vector<8x8xf32>
      %85 = vector.broadcast %27 : vector<1x8xf32> to vector<8x8xf32>
      %86 = arith.addf %84, %85 : vector<8x8xf32>
      %cst_55 = arith.constant dense<0xFF800000> : vector<8xf32>
      %87 = vector.multi_reduction <maximumf>, %86, %cst_55 [1] : vector<8x8xf32> to vector<8xf32>
      %88 = vector.shape_cast %87 : vector<8xf32> to vector<8x1xf32>
      %89 = vector.broadcast %88 : vector<8x1xf32> to vector<8x8xf32>
      %90 = arith.subf %86, %89 : vector<8x8xf32>
      %91 = math.exp %90 : vector<8x8xf32>
      %cst_56 = arith.constant dense<0.000000e+00> : vector<8xf32>
      %92 = vector.multi_reduction <add>, %91, %cst_56 [1] : vector<8x8xf32> to vector<8xf32>
      %93 = vector.shape_cast %92 : vector<8xf32> to vector<8x1xf32>
      %94 = tpu.reciprocal %93 {approx = true} : vector<8x1xf32> -> vector<8x1xf32>
      %95 = vector.broadcast %94 : vector<8x1xf32> to vector<8x8xf32>
      %96 = arith.mulf %91, %95 : vector<8x8xf32>
      %97 = arith.truncf %96 : vector<8x8xf32> to vector<8x8xbf16>
      %cst_57 = arith.constant dense<0.000000e+00> : vector<8x8xf32>
      %98 = tpu.matmul %97, %81, %cst_57 {dimension_numbers = #tpu.dot_dimension_numbers<[1], [0], [0], [1], [0, 0, 1, 1], [], []>} : vector<8x8xbf16>, vector<8x8xbf16>, vector<8x8xf32> -> vector<8x8xf32>
      %99 = arith.truncf %98 : vector<8x8xf32> to vector<8x8xbf16>
      %c0_58 = arith.constant 0 : index
      %c16_59 = arith.constant 16 : index
      %100 = vector.load %arg18[%c0_58, %c16_59] : memref<8x32xbf16, #tpu.memory_space<vmem>>, vector<8x8xbf16>
      tpu.vector_store %arg18[%c0_58, %c16_59], %99 {strides = array<i32>} : memref<8x32xbf16, #tpu.memory_space<vmem>>, vector<8x8xbf16>,
      %c0_60 = arith.constant 0 : index
      %c24 = arith.constant 24 : index
      %101 = vector.load %arg17[%c0_60, %c24] : memref<8x96xbf16, #tpu.memory_space<vmem>>, vector<8x8xbf16>
      %c0_61 = arith.constant 0 : index
      %c56 = arith.constant 56 : index
      %102 = vector.load %arg17[%c0_61, %c56] : memref<8x96xbf16, #tpu.memory_space<vmem>>, vector<8x8xbf16>
      %c0_62 = arith.constant 0 : index
      %c88 = arith.constant 88 : index
      %103 = vector.load %arg17[%c0_62, %c88] : memref<8x96xbf16, #tpu.memory_space<vmem>>, vector<8x8xbf16>
      %cst_63 = arith.constant dense<0.000000e+00> : vector<8x8xf32>
      %104 = tpu.matmul %101, %102, %cst_63 {dimension_numbers = #tpu.dot_dimension_numbers<[1], [1], [0], [0], [0, 0, 1, 0], [], []>} : vector<8x8xbf16>, vector<8x8xbf16>, vector<8x8xf32> -> vector<8x8xf32>
      %cst_64 = arith.constant 0.353553385 : f32
      %105 = vector.broadcast %cst_64 : f32 to vector<8x8xf32>
      %106 = arith.mulf %104, %105 : vector<8x8xf32>
      %107 = vector.broadcast %27 : vector<1x8xf32> to vector<8x8xf32>
      %108 = arith.addf %106, %107 : vector<8x8xf32>
      %cst_65 = arith.constant dense<0xFF800000> : vector<8xf32>
      %109 = vector.multi_reduction <maximumf>, %108, %cst_65 [1] : vector<8x8xf32> to vector<8xf32>
      %110 = vector.shape_cast %109 : vector<8xf32> to vector<8x1xf32>
      %111 = vector.broadcast %110 : vector<8x1xf32> to vector<8x8xf32>
      %112 = arith.subf %108, %111 : vector<8x8xf32>
      %113 = math.exp %112 : vector<8x8xf32>
      %cst_66 = arith.constant dense<0.000000e+00> : vector<8xf32>
      %114 = vector.multi_reduction <add>, %113, %cst_66 [1] : vector<8x8xf32> to vector<8xf32>
      %115 = vector.shape_cast %114 : vector<8xf32> to vector<8x1xf32>
      %116 = tpu.reciprocal %115 {approx = true} : vector<8x1xf32> -> vector<8x1xf32>
      %117 = vector.broadcast %116 : vector<8x1xf32> to vector<8x8xf32>
      %118 = arith.mulf %113, %117 : vector<8x8xf32>
      %119 = arith.truncf %118 : vector<8x8xf32> to vector<8x8xbf16>
      %cst_67 = arith.constant dense<0.000000e+00> : vector<8x8xf32>
      %120 = tpu.matmul %119, %103, %cst_67 {dimension_numbers = #tpu.dot_dimension_numbers<[1], [0], [0], [1], [0, 0, 1, 1], [], []>} : vector<8x8xbf16>, vector<8x8xbf16>, vector<8x8xf32> -> vector<8x8xf32>
      %121 = arith.truncf %120 : vector<8x8xf32> to vector<8x8xbf16>
      %c0_68 = arith.constant 0 : index
      %c24_69 = arith.constant 24 : index
      %122 = vector.load %arg18[%c0_68, %c24_69] : memref<8x32xbf16, #tpu.memory_space<vmem>>, vector<8x8xbf16>
      tpu.vector_store %arg18[%c0_68, %c24_69], %121 {strides = array<i32>} : memref<8x32xbf16, #tpu.memory_space<vmem>>, vector<8x8xbf16>,
      %c0_70 = arith.constant 0 : index
      %c0_71 = arith.constant 0 : index
      %123 = vector.load %arg18[%c0_70, %c0_71] : memref<8x32xbf16, #tpu.memory_space<vmem>>, vector<8x32xbf16>
      %c0_72 = arith.constant 0 : index
      %c0_73 = arith.constant 0 : index
      %124 = vector.load %arg6[%c0_72, %c0_73] : memref<32x32xbf16, #tpu.memory_space<vmem>>, vector<32x32xbf16>
      %cst_74 = arith.constant dense<0.000000e+00> : vector<8x32xf32>
      %125 = tpu.matmul %123, %124, %cst_74 {dimension_numbers = #tpu.dot_dimension_numbers<[1], [0], [0], [1], [0, 0, 1, 1], [], []>} : vector<8x32xbf16>, vector<32x32xbf16>, vector<8x32xf32> -> vector<8x32xf32>
      %c0_75 = arith.constant 0 : index
      %c0_76 = arith.constant 0 : index
      %126 = vector.load %arg7[%c0_75, %c0_76] : memref<1x32xf32, #tpu.memory_space<vmem>>, vector<1x32xf32>
      %127 = vector.broadcast %126 : vector<1x32xf32> to vector<8x32xf32>
      %128 = arith.addf %125, %127 : vector<8x32xf32>
      %129 = arith.addf %128, %24 : vector<8x32xf32>
      %c0_77 = arith.constant 0 : index
      %c0_78 = arith.constant 0 : index
      %130 = vector.load %arg8[%c0_77, %c0_78] : memref<1x32xf32, #tpu.memory_space<vmem>>, vector<1x32xf32>
      %c0_79 = arith.constant 0 : index
      %c0_80 = arith.constant 0 : index
      %131 = vector.load %arg9[%c0_79, %c0_80] : memref<1x32xf32, #tpu.memory_space<vmem>>, vector<1x32xf32>
      %cst_81 = arith.constant dense<0.000000e+00> : vector<8xf32>
      %132 = vector.multi_reduction <add>, %129, %cst_81 [1] : vector<8x32xf32> to vector<8xf32>
      %133 = vector.shape_cast %132 : vector<8xf32> to vector<8x1xf32>
      %cst_82 = arith.constant 3.200000e+01 : f32
      %134 = vector.broadcast %cst_82 : f32 to vector<8x1xf32>
      %135 = arith.divf %133, %134 : vector<8x1xf32>
      %136 = vector.broadcast %135 : vector<8x1xf32> to vector<8x32xf32>
      %137 = arith.subf %129, %136 : vector<8x32xf32>
      %138 = vector.broadcast %135 : vector<8x1xf32> to vector<8x32xf32>
      %139 = arith.subf %129, %138 : vector<8x32xf32>
      %140 = arith.mulf %137, %139 : vector<8x32xf32>
      %cst_83 = arith.constant dense<0.000000e+00> : vector<8xf32>
      %141 = vector.multi_reduction <add>, %140, %cst_83 [1] : vector<8x32xf32> to vector<8xf32>
      %142 = vector.shape_cast %141 : vector<8xf32> to vector<8x1xf32>
      %cst_84 = arith.constant 3.200000e+01 : f32
      %143 = vector.broadcast %cst_84 : f32 to vector<8x1xf32>
      %144 = arith.divf %142, %143 : vector<8x1xf32>
      %145 = vector.broadcast %135 : vector<8x1xf32> to vector<8x32xf32>
      %146 = arith.subf %129, %145 : vector<8x32xf32>
      %cst_85 = arith.constant 9.99999996E-13 : f32
      %147 = vector.broadcast %cst_85 : f32 to vector<8x1xf32>
      %148 = arith.addf %144, %147 : vector<8x1xf32>
      %149 = math.rsqrt %148 : vector<8x1xf32>
      %150 = vector.broadcast %149 : vector<8x1xf32> to vector<8x32xf32>
      %151 = arith.mulf %146, %150 : vector<8x32xf32>
      %152 = vector.broadcast %130 : vector<1x32xf32> to vector<8x32xf32>
      %153 = arith.mulf %151, %152 : vector<8x32xf32>
      %154 = vector.broadcast %131 : vector<1x32xf32> to vector<8x32xf32>
      %155 = arith.addf %153, %154 : vector<8x32xf32>
      %c0_86 = arith.constant 0 : index
      %c0_87 = arith.constant 0 : index
      %156 = vector.load %arg19[%c0_86, %c0_87] : memref<8x32xf32, #tpu.memory_space<vmem>>, vector<8x32xf32>
      tpu.vector_store %arg19[%c0_86, %c0_87], %155 {strides = array<i32>} : memref<8x32xf32, #tpu.memory_space<vmem>>, vector<8x32xf32>,
      %157 = arith.truncf %155 : vector<8x32xf32> to vector<8x32xbf16>
      %c0_88 = arith.constant 0 : index
      %c0_89 = arith.constant 0 : index
      %158 = vector.load %arg20[%c0_88, %c0_89] : memref<8x32xbf16, #tpu.memory_space<vmem>>, vector<8x32xbf16>
      tpu.vector_store %arg20[%c0_88, %c0_89], %157 {strides = array<i32>} : memref<8x32xbf16, #tpu.memory_space<vmem>>, vector<8x32xbf16>,
    } else {
    }
    %c0 = arith.constant 0 : index
    %c0_1 = arith.constant 0 : index
    %3 = vector.load %arg20[%c0, %c0_1] : memref<8x32xbf16, #tpu.memory_space<vmem>>, vector<8x32xbf16>
    %c0_2 = arith.constant 0 : index
    %c0_3 = arith.constant 0 : index
    %4 = vector.load %arg10[%c0_2, %c0_3] : memref<32x3072xbf16, #tpu.memory_space<vmem>>, vector<32x3072xbf16>
    %cst = arith.constant dense<0.000000e+00> : vector<8x3072xf32>
    %5 = tpu.matmul %3, %4, %cst {dimension_numbers = #tpu.dot_dimension_numbers<[1], [0], [0], [1], [0, 0, 1, 1], [], []>} : vector<8x32xbf16>, vector<32x3072xbf16>, vector<8x3072xf32> -> vector<8x3072xf32>
    %c0_4 = arith.constant 0 : index
    %c0_5 = arith.constant 0 : index
    %6 = vector.load %arg11[%c0_4, %c0_5] : memref<1x3072xf32, #tpu.memory_space<vmem>>, vector<1x3072xf32>
    %7 = vector.broadcast %6 : vector<1x3072xf32> to vector<8x3072xf32>
    %8 = arith.addf %5, %7 : vector<8x3072xf32>
    %cst_6 = arith.constant 0.000000e+00 : f32
    %9 = vector.broadcast %cst_6 : f32 to vector<8x3072xf32>
    %10 = arith.maximumf %8, %9 : vector<8x3072xf32>
    %11 = arith.truncf %10 : vector<8x3072xf32> to vector<8x3072xbf16>
    %c0_7 = arith.constant 0 : index
    %c0_8 = arith.constant 0 : index
    %12 = vector.load %arg12[%c0_7, %c0_8] : memref<3072x32xbf16, #tpu.memory_space<vmem>>, vector<3072x32xbf16>
    %cst_9 = arith.constant dense<0.000000e+00> : vector<8x32xf32>
    %13 = tpu.matmul %11, %12, %cst_9 {dimension_numbers = #tpu.dot_dimension_numbers<[1], [0], [0], [1], [0, 0, 1, 1], [], []>} : vector<8x3072xbf16>, vector<3072x32xbf16>, vector<8x32xf32> -> vector<8x32xf32>
    %c0_i32_10 = arith.constant 0 : i32
    %14 = arith.cmpi eq, %arg1, %c0_i32_10 : i32
    %15 = arith.extui %14 : i1 to i32
    %c0_i32_11 = arith.constant 0 : i32
    %16 = arith.cmpi ne, %15, %c0_i32_11 : i32
    scf.if %16 {
      %c0_16 = arith.constant 0 : index
      %c0_17 = arith.constant 0 : index
      %23 = vector.load %arg21[%c0_16, %c0_17] : memref<8x32xf32, #tpu.memory_space<vmem>>, vector<8x32xf32>
      tpu.vector_store %arg21[%c0_16, %c0_17], %13 {strides = array<i32>} : memref<8x32xf32, #tpu.memory_space<vmem>>, vector<8x32xf32>,
    } else {
    }
    %c0_i32_12 = arith.constant 0 : i32
    %17 = arith.cmpi sgt, %arg1, %c0_i32_12 : i32
    %18 = arith.extui %17 : i1 to i32
    %c0_i32_13 = arith.constant 0 : i32
    %19 = arith.cmpi ne, %18, %c0_i32_13 : i32
    scf.if %19 {
      %c0_16 = arith.constant 0 : index
      %c0_17 = arith.constant 0 : index
      %23 = vector.load %arg21[%c0_16, %c0_17] : memref<8x32xf32, #tpu.memory_space<vmem>>, vector<8x32xf32>
      %24 = arith.addf %23, %13 : vector<8x32xf32>
      %c0_18 = arith.constant 0 : index
      %c0_19 = arith.constant 0 : index
      %25 = vector.load %arg21[%c0_18, %c0_19] : memref<8x32xf32, #tpu.memory_space<vmem>>, vector<8x32xf32>
      tpu.vector_store %arg21[%c0_18, %c0_19], %24 {strides = array<i32>} : memref<8x32xf32, #tpu.memory_space<vmem>>, vector<8x32xf32>,
    } else {
    }
    %c0_i32_14 = arith.constant 0 : i32
    %20 = arith.cmpi eq, %arg1, %c0_i32_14 : i32
    %21 = arith.extui %20 : i1 to i32
    %c0_i32_15 = arith.constant 0 : i32
    %22 = arith.cmpi ne, %21, %c0_i32_15 : i32
    scf.if %22 {
      %c0_16 = arith.constant 0 : index
      %c0_17 = arith.constant 0 : index
      %23 = vector.load %arg21[%c0_16, %c0_17] : memref<8x32xf32, #tpu.memory_space<vmem>>, vector<8x32xf32>
      %c0_18 = arith.constant 0 : index
      %c0_19 = arith.constant 0 : index
      %24 = vector.load %arg13[%c0_18, %c0_19] : memref<1x32xf32, #tpu.memory_space<vmem>>, vector<1x32xf32>
      %25 = vector.broadcast %24 : vector<1x32xf32> to vector<8x32xf32>
      %26 = arith.addf %23, %25 : vector<8x32xf32>
      %c0_20 = arith.constant 0 : index
      %c0_21 = arith.constant 0 : index
      %27 = vector.load %arg19[%c0_20, %c0_21] : memref<8x32xf32, #tpu.memory_space<vmem>>, vector<8x32xf32>
      %28 = arith.addf %26, %27 : vector<8x32xf32>
      %c0_22 = arith.constant 0 : index
      %c0_23 = arith.constant 0 : index
      %29 = vector.load %arg14[%c0_22, %c0_23] : memref<1x32xf32, #tpu.memory_space<vmem>>, vector<1x32xf32>
      %c0_24 = arith.constant 0 : index
      %c0_25 = arith.constant 0 : index
      %30 = vector.load %arg15[%c0_24, %c0_25] : memref<1x32xf32, #tpu.memory_space<vmem>>, vector<1x32xf32>
      %cst_26 = arith.constant dense<0.000000e+00> : vector<8xf32>
      %31 = vector.multi_reduction <add>, %28, %cst_26 [1] : vector<8x32xf32> to vector<8xf32>
      %32 = vector.shape_cast %31 : vector<8xf32> to vector<8x1xf32>
      %cst_27 = arith.constant 3.200000e+01 : f32
      %33 = vector.broadcast %cst_27 : f32 to vector<8x1xf32>
      %34 = arith.divf %32, %33 : vector<8x1xf32>
      %35 = vector.broadcast %34 : vector<8x1xf32> to vector<8x32xf32>
      %36 = arith.subf %28, %35 : vector<8x32xf32>
      %37 = vector.broadcast %34 : vector<8x1xf32> to vector<8x32xf32>
      %38 = arith.subf %28, %37 : vector<8x32xf32>
      %39 = arith.mulf %36, %38 : vector<8x32xf32>
      %cst_28 = arith.constant dense<0.000000e+00> : vector<8xf32>
      %40 = vector.multi_reduction <add>, %39, %cst_28 [1] : vector<8x32xf32> to vector<8xf32>
      %41 = vector.shape_cast %40 : vector<8xf32> to vector<8x1xf32>
      %cst_29 = arith.constant 3.200000e+01 : f32
      %42 = vector.broadcast %cst_29 : f32 to vector<8x1xf32>
      %43 = arith.divf %41, %42 : vector<8x1xf32>
      %44 = vector.broadcast %34 : vector<8x1xf32> to vector<8x32xf32>
      %45 = arith.subf %28, %44 : vector<8x32xf32>
      %cst_30 = arith.constant 9.99999996E-13 : f32
      %46 = vector.broadcast %cst_30 : f32 to vector<8x1xf32>
      %47 = arith.addf %43, %46 : vector<8x1xf32>
      %48 = math.rsqrt %47 : vector<8x1xf32>
      %49 = vector.broadcast %48 : vector<8x1xf32> to vector<8x32xf32>
      %50 = arith.mulf %45, %49 : vector<8x32xf32>
      %51 = vector.broadcast %29 : vector<1x32xf32> to vector<8x32xf32>
      %52 = arith.mulf %50, %51 : vector<8x32xf32>
      %53 = vector.broadcast %30 : vector<1x32xf32> to vector<8x32xf32>
      %54 = arith.addf %52, %53 : vector<8x32xf32>
      %c0_31 = arith.constant 0 : index
      %c0_32 = arith.constant 0 : index
      %c0_33 = arith.constant 0 : index
      %55 = vector.load %arg16[%c0_31, %c0_32, %c0_33] : memref<1x8x32xf32, #tpu.memory_space<vmem>>, vector<1x8x32xf32>
      %56 = vector.shape_cast %55 : vector<1x8x32xf32> to vector<8x32xf32>
      %57 = vector.shape_cast %54 : vector<8x32xf32> to vector<1x8x32xf32>
      tpu.vector_store %arg16[%c0_31, %c0_32, %c0_33], %57 {strides = array<i32>} : memref<1x8x32xf32, #tpu.memory_space<vmem>>, vector<1x8x32xf32>,
    } else {
    }
    return
  }
  func.func @transform_0(%arg0: i32, %arg1: i32) -> (i32, i32, i32) {
    %c0_i32 = arith.constant 0 : i32
    %c0_i32_0 = arith.constant 0 : i32
    %c0_i32_1 = arith.constant 0 : i32
    return %arg0, %c0_i32, %c0_i32_0 : i32, i32, i32
  }
  func.func @transform_1(%arg0: i32, %arg1: i32) -> (i32, i32, i32) {
    %c0_i32 = arith.constant 0 : i32
    %c0_i32_0 = arith.constant 0 : i32
    %c0_i32_1 = arith.constant 0 : i32
    return %arg0, %c0_i32, %c0_i32_0 : i32, i32, i32
  }
  func.func @transform_2(%arg0: i32, %arg1: i32) -> (i32, i32) {
    %c0_i32 = arith.constant 0 : i32
    %c0_i32_0 = arith.constant 0 : i32
    %c0_i32_1 = arith.constant 0 : i32
    return %c0_i32, %c0_i32_0 : i32, i32
  }
  func.func @transform_3(%arg0: i32, %arg1: i32) -> (i32, i32) {
    %c0_i32 = arith.constant 0 : i32
    %c0_i32_0 = arith.constant 0 : i32
    %c0_i32_1 = arith.constant 0 : i32
    return %c0_i32, %c0_i32_0 : i32, i32
  }
  func.func @transform_4(%arg0: i32, %arg1: i32) -> (i32, i32) {
    %c0_i32 = arith.constant 0 : i32
    %c0_i32_0 = arith.constant 0 : i32
    %c0_i32_1 = arith.constant 0 : i32
    return %c0_i32, %c0_i32_0 : i32, i32
  }
  func.func @transform_5(%arg0: i32, %arg1: i32) -> (i32, i32) {
    %c0_i32 = arith.constant 0 : i32
    %c0_i32_0 = arith.constant 0 : i32
    %c0_i32_1 = arith.constant 0 : i32
    return %c0_i32, %c0_i32_0 : i32, i32
  }
  func.func @transform_6(%arg0: i32, %arg1: i32) -> (i32, i32) {
    %c0_i32 = arith.constant 0 : i32
    %c0_i32_0 = arith.constant 0 : i32
    %c0_i32_1 = arith.constant 0 : i32
    return %c0_i32, %c0_i32_0 : i32, i32
  }
  func.func @transform_7(%arg0: i32, %arg1: i32) -> (i32, i32) {
    %c0_i32 = arith.constant 0 : i32
    %c0_i32_0 = arith.constant 0 : i32
    %c0_i32_1 = arith.constant 0 : i32
    return %c0_i32, %c0_i32_0 : i32, i32
  }
  func.func @transform_8(%arg0: i32, %arg1: i32) -> (i32, i32) {
    %c0_i32 = arith.constant 0 : i32
    %c0_i32_0 = arith.constant 0 : i32
    %c0_i32_1 = arith.constant 0 : i32
    return %c0_i32, %c0_i32_0 : i32, i32
  }
  func.func @transform_9(%arg0: i32, %arg1: i32) -> (i32, i32) {
    %c0_i32 = arith.constant 0 : i32
    %c0_i32_0 = arith.constant 0 : i32
    %c0_i32_1 = arith.constant 0 : i32
    return %c0_i32, %c0_i32_0 : i32, i32
  }
  func.func @transform_10(%arg0: i32, %arg1: i32) -> (i32, i32) {
    %c0_i32 = arith.constant 0 : i32
    %c0_i32_0 = arith.constant 0 : i32
    %c0_i32_1 = arith.constant 0 : i32
    return %c0_i32, %c0_i32_0 : i32, i32
  }
  func.func @transform_11(%arg0: i32, %arg1: i32) -> (i32, i32) {
    %c0_i32 = arith.constant 0 : i32
    %c0_i32_0 = arith.constant 0 : i32
    %c0_i32_1 = arith.constant 0 : i32
    return %c0_i32, %c0_i32_0 : i32, i32
  }
  func.func @transform_12(%arg0: i32, %arg1: i32) -> (i32, i32) {
    %c0_i32 = arith.constant 0 : i32
    %c0_i32_0 = arith.constant 0 : i32
    %c0_i32_1 = arith.constant 0 : i32
    return %c0_i32, %c0_i32_0 : i32, i32
  }
  func.func @transform_13(%arg0: i32, %arg1: i32) -> (i32, i32) {
    %c0_i32 = arith.constant 0 : i32
    %c0_i32_0 = arith.constant 0 : i32
    %c0_i32_1 = arith.constant 0 : i32
    return %c0_i32, %c0_i32_0 : i32, i32
  }
  func.func @transform_14(%arg0: i32, %arg1: i32) -> (i32, i32, i32) {
    %c0_i32 = arith.constant 0 : i32
    %c0_i32_0 = arith.constant 0 : i32
    %c0_i32_1 = arith.constant 0 : i32
    return %arg0, %c0_i32, %c0_i32_0 : i32, i32, i32
  }
}

</mosaic_0001>

<bundles_post_ra>
// kernel: tpu_custom_call.1
= control target key start
LH: loop header
LB: loop body
LE: loop exit
PB: predicated region body
PF: predicated region fallthrough
CT: control target
= control target key end

     0   :  { %s6539_s0 = inlined_call_operand.vmem [shape: f32[2,8,32], index: 0, kind: input, shape index: {}]   ;;  %s6540_s1 = inlined_call_operand.vmem [shape: f32[2,1,8], index: 1, kind: input, shape index: {}]   ;;  %s6541_s2 = inlined_call_operand.vmem [shape: bf16[32,96], index: 2, kind: input, shape index: {}]   ;;  %s6542_s3 = inlined_call_operand.vmem [shape: f32[1,96], index: 3, kind: input, shape index: {}]   ;;  %s6543_s4 = inlined_call_operand.vmem [shape: bf16[32,32], index: 4, kind: input, shape index: {}]   ;;  %s6544_s5 = inlined_call_operand.vmem [shape: f32[1,32], index: 5, kind: input, shape index: {}]   ;;  %s6545_s6 = inlined_call_operand.vmem [shape: f32[1,32], index: 6, kind: input, shape index: {}]   ;;  %s6546_s7 = inlined_call_operand.vmem [shape: f32[1,32], index: 7, kind: input, shape index: {}]   ;;  %s6547_s8 = inlined_call_operand.vmem [shape: bf16[32,3072], index: 8, kind: input, shape index: {}]   ;;  %s6548_s9 = inlined_call_operand.vmem [shape: f32[1,3072], index: 9, kind: input, shape index: {}]   ;;  %s6549_s10 = inlined_call_operand.vmem [shape: bf16[3072,32], index: 10, kind: input, shape index: {}]   ;;  %s6550_s11 = inlined_call_operand.vmem [shape: f32[1,32], index: 11, kind: input, shape index: {}]   ;;  %s6551_s12 = inlined_call_operand.vmem [shape: f32[1,32], index: 12, kind: input, shape index: {}]   ;;  %s6552_s13 = inlined_call_operand.vmem [shape: f32[1,32], index: 13, kind: input, shape index: {}]   ;;  %s6553_s14 = inlined_call_operand.hbm [shape: f32[2,8,32], index: 14, kind: output, shape index: {}]  }
   0x1   :  { %6554 = sst [smem:[#allocation10_spill]] %s6539_s0 }
   0x2   :  { %6555 = sst [smem:[#allocation11_spill]] %s6540_s1 }
   0x3   :  { %6556 = sst [smem:[#allocation12_spill]] %s6541_s2 }
   0x4   :  { %6557 = sst [smem:[#allocation13_spill]] %s6542_s3 }
   0x5   :  { %6558 = sst [smem:[#allocation14_spill]] %s6543_s4 }
   0x6   :  { %6559 = sst [smem:[#allocation15_spill]] %s6544_s5 }
   0x7   :  { %19 = vsyncpa [#allocation8], 0 }
   0x8   :  { %21 = vsyncpa [#allocation8 + $0x1], 0  ;;  %s5401_s29 = smov 0   ;;  %s5403_s30 = smov 0  }
   0x9   :  { %s5405_s15 = smov 0   ;;  %s5407_s16 = smov 0  }
   0xa   :  { %s5409_s17 = smov 0   ;;  %s5411_s18 = smov 0  }
   0xb LB: > { %s4290_s19 = sadd.s32 4294967295, %s5306_s18   ;;  %s4291_s20 = sadd.s32 4294967294, %s5306_s18   ;;  %s5306_s18 = sphi %s5411_s18, %s27_s18   ;;  %s5302_s17 = sphi %s5409_s17, %s6572_s17   ;;  %s5298_s16 = sphi %s5407_s16, %s6571_s16   ;;  %s5294_s15 = sphi %s5405_s15, %s6570_s15   ;;  %s5290_s30 = sphi %s5403_s30, %s6569_s30   ;;  %s5286_s29 = sphi %s5401_s29, %s6568_s29  }
   0xc   : > { %s39_s21 = sadd.s32 1, %s5302_s17  ;;  %s350_s22 = sadd.s32 1, %s5294_s15 }
   0xd   : > { %p41_p0 = scmp.ge.s32.totalorder %s39_s21, 2  ;;  %p360_p1 = scmp.ne.s32.totalorder %s5294_s15, %s5290_s30 }
   0xe   : > { %p361_p2 = scmp.eq.s32.totalorder %s4290_s19, 1  ;;  %p366_p3 = scmp.ne.s32.totalorder %s5290_s30, %s5286_s29 }
   0xf   : > { %s6574_s21 = smov (%p41_p0, %s39_s21), 0  ;;  %p367_p5 = scmp.eq.s32.totalorder %s4291_s20, 1 }
  0x10   : > { %p5441_p4 = por %p361_p2, %p360_p1  ;;  %s347_s24 = ssub.s32 %s5302_s17, %s6574_s21 }
  0x11   : > { %p4294_p6 = scmp.ge.s32.totalorder %s5306_s18, 1  ;;  %p348_p7 = scmp.eq.s32.totalorder %s347_s24, 0 }
  0x12   : > { %p5448_p8 = por %p367_p5, %p366_p3  ;;  %p434_p9 = scmp.lt.s32.totalorder %s5306_s18, 3 }
  0x13   : > { %s5454_s26 = scalar_select %p348_p7, %s5294_s15, %s350_s22  }
  0x14   : > { %p435_p10 = pnand %p4294_p6, %p434_p9 }
  0x15   : > { %s6562_s2 = sld [smem:[#allocation12_spill]] (!%p435_p10)  ;;  %v5308_v1 = vmov (!%p435_p10), 0.0   ;;  %vm5309_vm0 = vmmov (!%p435_p10), 0   ;;  %p482_p11 = scmp.lt.s32.totalorder (!%p435_p10), %s5298_s16, 1  ;;  %vm520_vm1 = vcmask (!%p435_p10), 261120   ;;  %vm565_vm2 = vcmask (!%p435_p10), 781312  }
  0x16   : > { %438 = sbr.rel (%p435_p10) target bundleno = 2794 (0xaea), region = 76  ;;  %4871 = vmatprep.subr.bf16.mxu0 (!%p435_p10), %v5308_v1  ;;  %4879 = vmatprep.subr.bf16.mxu1 (!%p435_p10), %v5308_v1  ;;  %s6563_s0 = sld [smem:[#allocation10_spill]] (!%p435_p10)  ;;  %vm573_vm3 = vcmask (!%p435_p10), 64512   ;;  %vm645_vm4 = vcmask (!%p435_p10), 1043456   ;;  %vm690_vm5 = vcmask (!%p435_p10), 60416   ;;  %vm815_vm6 = vcmask (!%p435_p10), 126016  }
  0x17   : > { %4875 = vmatprep.mubr.msk.bf16.mxu0 (!%p435_p10), %vm5309_vm0, %v5308_v1  ;;  %4881 = vmatprep.mubr.msk.bf16.mxu1 (!%p435_p10), %vm5309_vm0, %v5308_v1  ;;  %s6564_s3 = sld [smem:[#allocation13_spill]] (!%p435_p10)  ;;  %s5311_s27 = smov (!%p435_p10), 96   ;;  %vm940_vm7 = vcmask (!%p435_p10), 191616   ;;  %vm1065_vm8 = vcmask (!%p435_p10), 257216   ;;  %vm1167_vm9 = vcmask (!%p435_p10), 257024  }
  0x18   : > { %s5313_s28 = smov (!%p435_p10), 88   ;;  %s5314_s20 = smov (!%p435_p10), 72  }
  0x19   : > { %s6565_s1 = sld [smem:[#allocation11_spill]] (!%p435_p10)  ;;  %s6566_s4 = sld [smem:[#allocation14_spill]] (!%p435_p10) }
  0x1a   : > { %s6567_s5 = sld [smem:[#allocation15_spill]] (!%p435_p10) }
  0x1b   : > { %v5007_v0 = vld [vmem:[%s6562_s2] sm:$0xff] (!%p435_p10)   ;;  %v5008_v2 = vld [vmem:[%s6562_s2 + $0x8] sm:$0xff] (!%p435_p10)   ;;  %s5312_s2 = smov (!%p435_p10), 80  }
  0x1c   : > { %4872 = vmatpush3.bf16.msra.mxu0 (!%p435_p10), %v5007_v0 }
  0x1d   : > { %4873 = vmatprep.subr.bf16.mxu0 %v5308_v1  ;;  %s5471_s22 = scalar_select %p482_p11, %s5298_s16, 1  ;;  %v4297_v5 = vld [vmem:[%s6564_s3] ss:$0 sm:$0xff] }
  0x1f   : > { %s4296_s24 = sshll.u32 %s5471_s22, 3 }
  0x20   : > { %4874 = vmatpush3.bf16.msra.mxu0 %v5008_v2  ;;  %s5477_s19 = scalar_lea.vmem %s6563_s0, %s4296_s24  ;;  %s5310_s24 = smov 120  }
  0x21   : > { %4885 = vmatprep.subr.bf16.mxu0 %v5308_v1  ;;  %v494_v3 = vld [vmem:[%s5477_s19] sm:$0xff]  ;;  %s5315_s0 = smov 112  }
  0x22   : > { %v495_v4 = vpack.c.bf16 %v494_v3, %v494_v3 }
  0x24   : > { %4876 = vmatmul.mubr.msk.bf16.vlgmr.msra.gmra.mrb[0].mxu0 %vm520_vm1, %v495_v4 }
  0x25   : > { %4887 = vmatprep.mubr.msk.bf16.mxu0 %vm5309_vm0, %v5308_v1 }
  0xf7   : > { %v558_v6 = vpop.f32.mrb[0].mxu0 }
  0xf8   : > { %v559_v7 = vadd.f32 %v4297_v5, %v558_v6  ;;  %v4877_v8 = vpop.f32.mrb[1].mxu0 }
  0xf9   : > { %v561_v9 = vpop.f32.mrb[2].mxu0 }
  0xfa   : > { %v564_v10 = vpack.c.bf16 %v559_v7, %v559_v7  ;;  %v4878_v11 = vpop.f32.mrb[3].mxu0 }
  0xfc   : > { %566 = vst.msk [vmem:[#allocation2] sm:$0xf] %vm565_vm2, %v564_v10 }
 0x103   : > { %v5487_v12 = vld [vmem:[#allocation2] ss:$0 sps:$4 sm:$0xff]  }
 0x104   : > { %v567_v13 = vld [vmem:[#allocation2] sm:$0xf]  ;;  %696 = vrot.lane.b32.xlu1 %v5487_v12, %s5310_s24  ;;  %s5316_s24 = smov 104  }
 0x105   : > { %v5489_v14 = vcombine.low %v567_v13, %v567_v13  ;;  %v5493_v15 = vld [vmem:[#allocation2] ss:$0 sps:$4 sm:$0xff]  }
 0x106   : > { %v5497_v16 = vld [vmem:[#allocation2] ss:$0 sps:$4 sm:$0xff]  }
 0x107   : > { %571 = vrot.lane.b32.xlu0 %v5489_v14, %s5311_s27 }
 0x108   : > { %823 = vrot.lane.b32.xlu1 %v5493_v15, %s5312_s2  ;;  %s488_s2 = scalar_lea.vmem %s6565_s1, %s5471_s22  ;;  %s5317_s22 = smov 56  }
 0x109   : > { %v4303_v29 = vld [vmem:[%s488_s2] ss:$0 sm:$0xff] }
 0x10b   : > { %698 = vrot.lane.b32.xlu0 %v5487_v12, %s5313_s28  ;;  %s5318_s28 = smov 64  }
 0x10c   : > { %948 = vrot.lane.b32.xlu1 %v5497_v16, %s5314_s20  ;;  %s5319_s20 = smov 40  }
 0x10f   : > { %821 = vrot.lane.b32.xlu0 %v5493_v15, %s5315_s0  ;;  %s5321_s0 = smov 8  }
 0x113   : > { %946 = vrot.lane.b32.xlu0 %v5497_v16, %s5316_s24  ;;  %s5320_s24 = smov 48  }
 0x176   : > { %v697_v20 = vpop.permute.xlu1 %696 }
 0x179   : > { %v572_v17 = vpop.permute.xlu0 %571 }
 0x17a   : > { %v578_v18 = vsel %vm573_vm3, %v572_v17, 0  ;;  %v824_v22 = vpop.permute.xlu1 %823 }
 0x17b   : > { %4880 = vmatpush3.bf16.xpose.msra.mxu1 %v578_v18  ;;  %v829_v23 = vsel %vm573_vm3, %v824_v22, 0 }
 0x17c   : > { %4891 = vmatprep.subr.bf16.mxu1 %v5308_v1 }
 0x17d   : > { %v699_v19 = vpop.permute.xlu0 %698 }
 0x17e   : > { %v704_v21 = vsel %vm573_vm3, %v699_v19, 0  ;;  %v949_v24 = vpop.permute.xlu1 %948 }
 0x17f   : > { %v954_v26 = vsel %vm573_vm3, %v949_v24, 0 }
 0x181   : > { %v822_v25 = vpop.permute.xlu0 %821 }
 0x182   : > { %4882 = vmatmul.mubr.msk.bf16.vlgmr.msra.gmra.mrb[0].mxu1 %vm573_vm3, %v567_v13 }
 0x183   : > { %4892 = vmatpush3.bf16.xpose.msra.mxu1 %v704_v21  ;;  %4893 = vmatprep.mubr.msk.bf16.mxu1 %vm5309_vm0, %v5308_v1 }
 0x184   : > { %4903 = vmatprep.subr.bf16.mxu1 %v5308_v1 }
 0x185   : > { %v947_v27 = vpop.permute.xlu0 %946 }
 0x18a   : > { %4894 = vmatmul.mubr.msk.bf16.vlgmr.msra.gmra.mrb[4].mxu1 %vm573_vm3, %v697_v20 }
 0x18b   : > { %4904 = vmatpush3.bf16.xpose.msra.mxu1 %v829_v23  ;;  %4905 = vmatprep.mubr.msk.bf16.mxu1 %vm5309_vm0, %v5308_v1 }
 0x18c   : > { %4915 = vmatprep.subr.bf16.mxu1 %v5308_v1 }
 0x192   : > { %4906 = vmatmul.mubr.msk.bf16.vlgmr.msra.gmra.mrb[8].mxu1 %vm573_vm3, %v822_v25 }
 0x193   : > { %4916 = vmatpush3.bf16.xpose.msra.mxu1 %v954_v26  ;;  %4917 = vmatprep.mubr.msk.bf16.mxu1 %vm5309_vm0, %v5308_v1 }
 0x194   : > { %4927 = vmatprep.subr.bf16.mxu1 %v5308_v1 }
 0x19a   : > { %4918 = vmatmul.mubr.msk.bf16.vlgmr.msra.gmra.mrb[12].mxu1 %vm573_vm3, %v947_v27 }
 0x19b   : > { %4931 = vmatprep.mubr.msk.bf16.mxu1 %vm5309_vm0, %v5308_v1 }
 0x255   : > { %v614_v28 = vpop.f32.mrb[0].mxu1 }
 0x256   : > { %v620_v30 = vmul.f32 0.35355338, %v614_v28  ;;  %v4883_v31 = vpop.f32.mrb[1].mxu1 }
 0x257   : > { %v617_v32 = vpop.f32.mrb[2].mxu1 }
 0x258   : > { %v4884_v33 = vpop.f32.mrb[3].mxu1  ;;  %v627_v34 = vadd.f32 %v4303_v29, %v620_v30 }
 0x25a   : > { %v628_v35 = vsel %vm573_vm3, %v627_v34, -inf }
 0x25b   : > { %629 = vmax.xlane.f32.xlu1 %v628_v35 }
 0x25d   : > { %v740_v36 = vpop.f32.mrb[4].mxu1 }
 0x25e   : > { %v746_v37 = vmul.f32 0.35355338, %v740_v36  ;;  %v4895_v38 = vpop.f32.mrb[5].mxu1 }
 0x25f   : > { %v743_v39 = vpop.f32.mrb[6].mxu1 }
 0x260   : > { %v4896_v40 = vpop.f32.mrb[7].mxu1  ;;  %v747_v41 = vadd.f32 %v4303_v29, %v746_v37 }
 0x262   : > { %v748_v42 = vsel %vm573_vm3, %v747_v41, -inf }
 0x263   : > { %749 = vmax.xlane.f32.xlu0 %v748_v42 }
 0x265   : > { %v865_v43 = vpop.f32.mrb[8].mxu1 }
 0x266   : > { %v871_v44 = vmul.f32 0.35355338, %v865_v43  ;;  %v4907_v45 = vpop.f32.mrb[9].mxu1 }
 0x267   : > { %v868_v46 = vpop.f32.mrb[10].mxu1 }
 0x268   : > { %v4908_v47 = vpop.f32.mrb[11].mxu1  ;;  %v872_v48 = vadd.f32 %v4303_v29, %v871_v44 }
 0x26a   : > { %v873_v49 = vsel %vm573_vm3, %v872_v48, -inf }
 0x26b   : > { %874 = vmax.xlane.f32.xlu0 %v873_v49 }
 0x26d   : > { %v990_v50 = vpop.f32.mrb[12].mxu1 }
 0x26e   : > { %v996_v51 = vmul.f32 0.35355338, %v990_v50  ;;  %v4919_v52 = vpop.f32.mrb[13].mxu1  ;;  %v5014_v50 = vld [vmem:[%s6566_s4 + $0x8] sm:$0xff]  }
 0x26f   : > { %v993_v53 = vpop.f32.mrb[14].mxu1 }
 0x270   : > { %v4920_v54 = vpop.f32.mrb[15].mxu1  ;;  %v997_v55 = vadd.f32 %v4303_v29, %v996_v51 }
 0x272   : > { %v998_v56 = vsel %vm573_vm3, %v997_v55, -inf }
 0x273   : > { %999 = vmax.xlane.f32.xlu1 %v998_v56 }
 0x2e8   : > { %v630_v57 = vpop.xlane.xlu1 %629 }
 0x2e9   : > { %v631_v58 = vsub.f32 %v627_v34, %v630_v57 }
 0x2eb   : > { %v632_v59 = vmul.f32 1.442695, %v631_v58 }
 0x2ed   : > { %5207 = vpow2.f32 %v632_v59 }
 0x2f0   : > { %v750_v60 = vpop.xlane.xlu0 %749 }
 0x2f1   : > { %v751_v61 = vsub.f32 %v747_v41, %v750_v60 }
 0x2f3   : > { %v752_v62 = vmul.f32 1.442695, %v751_v61 }
 0x2f5   : > { %5209 = vpow2.f32 %v752_v62 }
 0x2f7   : > { %v5208_v63 = vpop.eup %5207 }
 0x2f8   : > { %v875_v0 = vpop.xlane.xlu0 %874  ;;  %v634_v2 = vsel %vm573_vm3, %v5208_v63, 0.0 }
 0x2f9   : > { %v876_v3 = vsub.f32 %v872_v48, %v875_v0  ;;  %635 = vadd.xlane.f32.xlu0 %v634_v2  ;;  %v5013_v48 = vld [vmem:[%s6566_s4] sm:$0xff]  }
 0x2fa   : > { %4928 = vmatpush3.bf16.msra.mxu1 %v5013_v48 }
 0x2fb   : > { %v877_v4 = vmul.f32 1.442695, %v876_v3  ;;  %4929 = vmatprep.subr.bf16.mxu1 %v5308_v1 }
 0x2fd   : > { %5211 = vpow2.f32 %v877_v4 }
 0x2fe   : > { %4930 = vmatpush3.bf16.msra.mxu1 %v5014_v50  ;;  %v1208_v50 = vld [vmem:[%s6547_s8 + $0x130] sm:$0xff] }
 0x2ff   : > { %v5210_v5 = vpop.eup %5209 }
 0x300   : > { %v754_v6 = vsel %vm573_vm3, %v5210_v5, 0.0  ;;  %v1000_v9 = vpop.xlane.xlu1 %999 }
 0x301   : > { %755 = vadd.xlane.f32.xlu1 %v754_v6  ;;  %v1001_v10 = vsub.f32 %v997_v55, %v1000_v9  ;;  %v5227_v6 = vld [vmem:[%s5477_s19] sm:$0xff] }
 0x303   : > { %v1002_v11 = vmul.f32 1.442695, %v1001_v10 }
 0x305   : > { %5213 = vpow2.f32 %v1002_v11 }
 0x307   : > { %v5212_v7 = vpop.eup %5211 }
 0x308   : > { %v879_v8 = vsel %vm573_vm3, %v5212_v7, 0.0 }
 0x309   : > { %880 = vadd.xlane.f32.xlu0 %v879_v8 }
 0x30f   : > { %v5214_v13 = vpop.eup %5213 }
 0x310   : > { %v1004_v17 = vsel %vm573_vm3, %v5214_v13, 0.0 }
 0x312   : > { %760 = vrot.lane.b32.xlu1 %v5487_v12, %s5317_s22 }
 0x31f   : > { %640 = vrot.lane.b32.xlu0 %v5489_v14, %s5318_s28  ;;  %s479_s28 = sand.u32 1, %s5290_s30  }
 0x320   : > { %s4201_s19 = scalar_lea.sflag [#allocation8], %s479_s28 }
 0x323   : > { %1010 = vrot.lane.b32.xlu0 %v5497_v16, %s5319_s20  ;;  %s5322_s20 = smov 16  }
 0x336   : > { %1005 = vadd.xlane.f32.xlu1 %v1004_v17 }
 0x347   : > { %885 = vrot.lane.b32.xlu1 %v5493_v15, %s5320_s24  ;;  %s5323_s24 = smov 24  }
 0x386   : > { %v636_v18 = vpop.xlane.xlu0 %635 }
 0x387   : > { %5215 = vrcp.f32 %v636_v18  ;;  %v1170_v18 = vld [vmem:[%s6547_s8] sm:$0xff] }
 0x38e   : > { %v756_v12 = vpop.xlane.xlu1 %755 }
 0x38f   : > { %5217 = vrcp.f32 %v756_v12  ;;  %v1182_v12 = vld [vmem:[%s6547_s8 + $0x60] sm:$0xff] }
 0x391   : > { %v5216_v19 = vpop.eup %5215 }
 0x392   : > { %v638_v14 = vmul.f32 %v5216_v19, %v5208_v63  ;;  %v761_v22 = vpop.permute.xlu1 %760  ;;  %v4317_v63 = vld [vmem:[%s6567_s5] ss:$0 sm:$0xff]  ;;  %v1171_v19 = vld [vmem:[%s6547_s8 + $0x8] sm:$0xff] }
 0x393   : > { %v766_v25 = vsel %vm645_vm4, %v761_v22, 0  ;;  %v1206_v22 = vld [vmem:[%s6547_s8 + $0x120] sm:$0xff] }
 0x394   : > { %v639_v23 = vpack.c.bf16 %v638_v14, %v638_v14  ;;  %v4324_v14 = vcombine.high %v1170_v18, %v1182_v12 }
 0x396   : > { %v881_v20 = vpop.xlane.xlu0 %880 }
 0x397   : > { %5219 = vrcp.f32 %v881_v20  ;;  %v4323_v20 = vcombine.low %v1170_v18, %v1182_v12 }
 0x399   : > { %v5218_v24 = vpop.eup %5217 }
 0x39a   : > { %v641_v21 = vpop.permute.xlu0 %640  ;;  %v758_v15 = vmul.f32 %v5218_v24, %v5210_v5 }
 0x39b   : > { %v647_v16 = vsel %vm645_vm4, %v641_v21, 0  ;;  %v1183_v21 = vld [vmem:[%s6547_s8 + $0x68] sm:$0xff] }
 0x39c   : > { %4886 = vmatpush3.bf16.msra.mxu0 %v647_v16  ;;  %v759_v26 = vpack.c.bf16 %v758_v15, %v758_v15  ;;  %v1194_v16 = vld [vmem:[%s6547_s8 + $0xc0] sm:$0xff]  ;;  %v4326_v24 = vcombine.high %v1171_v19, %v1183_v21  ;;  %v1195_v15 = vld [vmem:[%s6547_s8 + $0xc8] sm:$0xff] }
 0x39d   : > { %4897 = vmatprep.subr.bf16.mxu0 %v5308_v1 }
 0x39e   : > { %v1011_v32 = vpop.permute.xlu0 %1010  ;;  %1629 = vmatprep.subr.bf16.mxu1 %v4326_v24 }
 0x39f   : > { %4888 = vmatmul.mubr.msk.bf16.vlgmr.msra.gmra.mrb[4].mxu0 %vm573_vm3, %v639_v23  ;;  %v1016_v34 = vsel %vm645_vm4, %v1011_v32, 0  ;;  %v4325_v23 = vcombine.low %v1171_v19, %v1183_v21  ;;  %v1184_v32 = vld [vmem:[%s6547_s8 + $0x70] sm:$0xff]  ;;  %v1213_v21 = vld [vmem:[%s6547_s8 + $0x158] sm:$0xff] }
 0x3a0   : > { %4898 = vmatpush3.bf16.msra.mxu0 %v766_v25  ;;  %4899 = vmatprep.mubr.msk.bf16.mxu0 %vm5309_vm0, %v5308_v1  ;;  %v4348_v25 = vcombine.high %v1194_v16, %v1206_v22  ;;  %v1200_v19 = vld [vmem:[%s6547_s8 + $0xf0] sm:$0xff] }
 0x3a1   : > { %4909 = vmatprep.subr.bf16.mxu0 %v5308_v1  ;;  %v5220_v27 = vpop.eup %5219 }
 0x3a2   : > { %v883_v29 = vmul.f32 %v5220_v27, %v5212_v7  ;;  %v5324_v27 = vmov 0  }
 0x3a4   : > { %v884_v33 = vpack.c.bf16 %v883_v29, %v883_v29  ;;  %v4347_v29 = vcombine.low %v1194_v16, %v1206_v22 }
 0x3a7   : > { %4900 = vmatmul.mubr.msk.bf16.vlgmr.msra.gmra.mrb[8].mxu0 %vm573_vm3, %v759_v26  ;;  %v1207_v26 = vld [vmem:[%s6547_s8 + $0x128] sm:$0xff] }
 0x3a8   : > { %4911 = vmatprep.mubr.msk.bf16.mxu0 %vm5309_vm0, %v5308_v1 }
 0x3c3   : > { %v1006_v28 = vpop.xlane.xlu1 %1005 }
 0x3c4   : > { %5221 = vrcp.f32 %v1006_v28  ;;  %v4350_v28 = vcombine.high %v1195_v15, %v1207_v26 }
 0x3c7   : > { %v886_v30 = vpop.permute.xlu1 %885 }
 0x3c8   : > { %v891_v31 = vsel %vm645_vm4, %v886_v30, 0  ;;  %v4349_v30 = vcombine.low %v1195_v15, %v1207_v26  ;;  %v1190_v15 = vld [vmem:[%s6547_s8 + $0xa0] sm:$0xff]  ;;  %v1179_v26 = vld [vmem:[%s6547_s8 + $0x48] sm:$0xff] }
 0x3c9   : > { %4910 = vmatpush3.bf16.msra.mxu0 %v891_v31  ;;  %v1172_v31 = vld [vmem:[%s6547_s8 + $0x10] sm:$0xff] }
 0x3ca   : > { %4921 = vmatprep.subr.bf16.mxu0 %v5308_v1 }
 0x3cc   : > { %4912 = vmatmul.mubr.msk.bf16.vlgmr.msra.gmra.mrb[12].mxu0 %vm573_vm3, %v884_v33  ;;  %v1173_v33 = vld [vmem:[%s6547_s8 + $0x18] sm:$0xff] }
 0x3cd   : > { %4922 = vmatpush3.bf16.msra.mxu0 %v1016_v34  ;;  %4923 = vmatprep.mubr.msk.bf16.mxu0 %vm5309_vm0, %v5308_v1  ;;  %v4327_v34 = vcombine.low %v1172_v31, %v1184_v32 }
 0x3ce   : > { %v5222_v35 = vpop.eup %5221  ;;  %1588 = vmatprep.subr.bf16.mxu0 %v4324_v14  ;;  %v1201_v14 = vld [vmem:[%s6547_s8 + $0xf8] sm:$0xff] }
 0x3cf   : > { %v1008_v36 = vmul.f32 %v5222_v35, %v5214_v13  ;;  %v4328_v35 = vcombine.high %v1172_v31, %v1184_v32  ;;  %v4362_v24 = vcombine.high %v1201_v14, %v1213_v21 }
 0x3d1   : > { %v1009_v37 = vpack.c.bf16 %v1008_v36, %v1008_v36  ;;  %v1185_v36 = vld [vmem:[%s6547_s8 + $0x78] sm:$0xff] }
 0x3d4   : > { %4924 = vmatmul.mubr.msk.bf16.vlgmr.msra.gmra.mrb[16].mxu0 %vm573_vm3, %v1009_v37  ;;  %v4329_v37 = vcombine.low %v1173_v33, %v1185_v36 }
 0x3d5   : > { %1620 = vmatprep.mubr.bf16.mxu0 %v5324_v27  ;;  %1589 = vmatpush1.bf16.msra.mxu0 %v4323_v20  ;;  %v1212_v20 = vld [vmem:[%s6547_s8 + $0x150] sm:$0xff] }
 0x3d6   : > { %1590 = vmatprep.subr.bf16.mxu0 %v4348_v25  ;;  %v1178_v25 = vld [vmem:[%s6547_s8 + $0x40] sm:$0xff] }
 0x3d7   : > { %v4340_v31 = vcombine.high %v1178_v25, %v1190_v15 }
 0x3d9   : > { %1591 = vmatpush1.bf16.msra.mxu0 %v4347_v29  ;;  %v4359_v29 = vcombine.low %v1200_v19, %v1212_v20 }
 0x3da   : > { %1670 = vmatprep.subr.bf16.mxu0 %v4328_v35  ;;  %v1203_v35 = vld [vmem:[%s6547_s8 + $0x108] sm:$0xff] }
 0x472   : > { %v683_v38 = vpop.f32.mrb[4].mxu0 }
 0x473   : > { %v689_v39 = vpack.c.bf16 %v683_v38, %v683_v38  ;;  %v4889_v40 = vpop.f32.mrb[5].mxu0  ;;  %v4330_v38 = vcombine.high %v1173_v33, %v1185_v36  ;;  %v1202_v33 = vld [vmem:[%s6547_s8 + $0x100] sm:$0xff]  ;;  %v1215_v36 = vld [vmem:[%s6547_s8 + $0x168] sm:$0xff] }
 0x474   : > { %v686_v41 = vpop.f32.mrb[6].mxu0 }
 0x475   : > { %691 = vst.msk [vmem:[#allocation3] sm:$0xf] %vm690_vm5, %v689_v39  ;;  %v4890_v42 = vpop.f32.mrb[7].mxu0 }
 0x47a   : > { %v802_v43 = vpop.f32.mrb[8].mxu0 }
 0x47b   : > { %v4582_v44 = vpack.c.bf16 %v802_v43, %v802_v43  ;;  %v4901_v45 = vpop.f32.mrb[9].mxu0  ;;  %v4321_v43 = vld [vmem:[%s6545_s6] ss:$0 sm:$0xff] }
 0x47c   : > { %v805_v46 = vpop.f32.mrb[10].mxu0  ;;  %v4322_v45 = vld [vmem:[%s6546_s7] ss:$0 sm:$0xff] }
 0x47d   : > { %812 = vrot.lane.b32.xlu1 %v4582_v44, %s5321_s0  ;;  %v4902_v47 = vpop.f32.mrb[11].mxu0  ;;  %s4579_s0 = sshll.u32 %s5298_s16, 7  ;;  %s5325_s16 = smov [#allocation7]  }
 0x47e   : > { %s6491_s5 = scalar_lea.hbm %s6553_s14, %s4579_s0 }
 0x49f   : > { %v927_v49 = vpop.f32.mrb[12].mxu0 }
 0x4a0   : > { %v4583_v51 = vpack.c.bf16 %v927_v49, %v927_v49  ;;  %v4913_v52 = vpop.f32.mrb[13].mxu0  ;;  %v1196_v49 = vld [vmem:[%s6547_s8 + $0xd0] sm:$0xff] }
 0x4a1   : > { %v930_v53 = vpop.f32.mrb[14].mxu0  ;;  %v1209_v52 = vld [vmem:[%s6547_s8 + $0x138] sm:$0xff] }
 0x4a2   : > { %937 = vrot.lane.b32.xlu0 %v4583_v51, %s5322_s20  ;;  %v4914_v54 = vpop.f32.mrb[15].mxu0  ;;  %v1197_v51 = vld [vmem:[%s6547_s8 + $0xd8] sm:$0xff]  ;;  %v4352_v53 = vcombine.high %v1196_v49, %v1208_v50  ;;  %s4295_s20 = sshll.u32 %s479_s28, 3 }
 0x4a3   : > { %v4354_v54 = vcombine.high %v1197_v51, %v1209_v52  ;;  %s481_s27 = scalar_lea.vmem [#allocation7], %s4295_s20  ;;  %s5232_s20 = sshll.u32 %s5325_s16, 4  ;;  %s5233_s20 = int_to_ptr.vmem [resolvable:$false] %s5232_s20 }
 0x4a4   : > { %s4214_s2 = sshll.u32 %s481_s27, 4  ;;  %s5234_s1 = scalar_lea.vmem %s5233_s20, 256  ;;  %s6493_s2 = int_to_ptr.vmem [resolvable:$true] %s4214_s2 }
 0x4a5   : > { %p5235_p1 = scmp.lt.s32.totalorder %s6493_s2, %s5233_s20 }
 0x4a7   : > { %v1052_v55 = vpop.f32.mrb[16].mxu0 }
 0x4a8   : > { %v4584_v56 = vpack.c.bf16 %v1052_v55, %v1052_v55  ;;  %v4925_v57 = vpop.f32.mrb[17].mxu0  ;;  %v1174_v55 = vld [vmem:[%s6547_s8 + $0x20] sm:$0xff] }
 0x4a9   : > { %v1055_v58 = vpop.f32.mrb[18].mxu0 }
 0x4aa   : > { %1062 = vrot.lane.b32.xlu1 %v4584_v56, %s5323_s24  ;;  %v4926_v59 = vpop.f32.mrb[19].mxu0  ;;  %v1186_v56 = vld [vmem:[%s6547_s8 + $0x80] sm:$0xff]  ;;  %v1175_v58 = vld [vmem:[%s6547_s8 + $0x28] sm:$0xff]  ;;  %s5228_s24 = scalar_lea.vmem %s6493_s2, 128 }
 0x4ab   : > { %v1187_v59 = vld [vmem:[%s6547_s8 + $0x88] sm:$0xff]  ;;  %p5229_p12 = scmp.ne.s32.totalorder %s6493_s2, %s5228_s24  ;;  %p5236_p2 = scmp.lt.s32.totalorder %s5234_s1, %s5228_s24 }
 0x4ad   : > { %p5230_p13 = pnand %p5229_p12, %p5441_p4  ;;  %p5237_p3 = por %p5236_p2, %p5235_p1 }
 0x4af   : > { %p5231_p0 = pneg %p5230_p13 }
 0x4b1   : > { %p5238_p5 = pnand %p5237_p3, %p5231_p0 }
 0x4ef   : > { %v813_v60 = vpop.permute.xlu1 %812 }
 0x4f0   : > { %816 = vst.msk [vmem:[#allocation3] sm:$0xf] %vm815_vm6, %v813_v60  ;;  %v4351_v60 = vcombine.low %v1196_v49, %v1208_v50  ;;  %v1204_v49 = vld [vmem:[%s6547_s8 + $0x110] sm:$0xff] }
 0x4f1   : > { %v1216_v50 = vld [vmem:[%s6547_s8 + $0x170] sm:$0xff] }
 0x514   : > { %v938_v61 = vpop.permute.xlu0 %937 }
 0x515   : > { %941 = vst.msk [vmem:[#allocation3] sm:$0xf] %vm940_vm7, %v938_v61  ;;  %v4353_v61 = vcombine.low %v1197_v51, %v1209_v52  ;;  %v1205_v51 = vld [vmem:[%s6547_s8 + $0x118] sm:$0xff] }
 0x516   : > { %v1217_v52 = vld [vmem:[%s6547_s8 + $0x178] sm:$0xff] }
 0x51c   : > { %v1063_v1 = vpop.permute.xlu1 %1062 }
 0x51d   : > { %1066 = vst.msk [vmem:[#allocation3] sm:$0xf] %vm1065_vm8, %v1063_v1  ;;  %v4332_v1 = vcombine.high %v1174_v55, %v1186_v56 }
 0x524   : > { %v1067_v62 = vld [vmem:[#allocation3] sm:$0xf] }
 0x525   : > { %4932 = vmatmul.mubr.msk.bf16.vlgmr.msra.gmra.mrb[16].mxu1 %vm520_vm1, %v1067_v62  ;;  %v4334_v62 = vcombine.high %v1175_v58, %v1187_v59 }
 0x526   : > { %1661 = vmatprep.mubr.bf16.mxu1 %v5324_v27  ;;  %1630 = vmatpush1.bf16.msra.mxu1 %v4325_v23  ;;  %v4360_v23 = vcombine.high %v1200_v19, %v1212_v20  ;;  %v5037_v19 = vld [vmem:[%s6549_s10 + $0x28] sm:$0xff]  }
 0x527   : > { %1631 = vmatprep.subr.bf16.mxu1 %v4350_v28  ;;  %v1191_v28 = vld [vmem:[%s6547_s8 + $0xa8] sm:$0xff] }
 0x528   : > { %v4342_v32 = vcombine.high %v1179_v26, %v1191_v28  ;;  %v5038_v20 = vld [vmem:[%s6549_s10 + $0xa8] sm:$0xff]  }
 0x52a   : > { %1632 = vmatpush1.bf16.msra.mxu1 %v4349_v30  ;;  %v4361_v30 = vcombine.low %v1201_v14, %v1213_v21  ;;  %v5039_v14 = vld [vmem:[%s6549_s10 + $0x70] sm:$0xff]  }
 0x52b   : > { %1711 = vmatprep.subr.bf16.mxu1 %v4330_v38  ;;  %v4341_v38 = vcombine.low %v1179_v26, %v1191_v28  ;;  %v5040_v21 = vld [vmem:[%s6549_s10 + $0xf0] sm:$0xff]   ;;  %v5047_v26 = vld [vmem:[%s6549_s10 + $0x140] sm:$0xff]  }
 0x52c   : > { %v5048_v28 = vld [vmem:[%s6549_s10 + $0x1c0] sm:$0xff]  }
 0x5f8   : > { %v1128_v0 = vpop.f32.mrb[16].mxu1 }
 0x5f9   : > { %v1129_v2 = vadd.f32 %v4317_v63, %v1128_v0  ;;  %v4933_v3 = vpop.f32.mrb[17].mxu1  ;;  %v1198_v63 = vld [vmem:[%s6547_s8 + $0xe0] sm:$0xff] }
 0x5fa   : > { %v1131_v4 = vpop.f32.mrb[18].mxu1  ;;  %v1210_v0 = vld [vmem:[%s6547_s8 + $0x140] sm:$0xff]  ;;  %v1211_v3 = vld [vmem:[%s6547_s8 + $0x148] sm:$0xff] }
 0x5fb   : > { %v4934_v5 = vpop.f32.mrb[19].mxu1  ;;  %v1134_v7 = vadd.f32 %v5227_v6, %v1129_v2  ;;  %v1199_v2 = vld [vmem:[%s6547_s8 + $0xe8] sm:$0xff]  ;;  %v4331_v4 = vcombine.low %v1174_v55, %v1186_v56  ;;  %v4356_v6 = vcombine.high %v1198_v63, %v1210_v0  ;;  %v4368_v55 = vcombine.high %v1204_v49, %v1216_v50 }
 0x5fc   : > { %v4333_v5 = vcombine.low %v1175_v58, %v1187_v59  ;;  %v4370_v56 = vcombine.high %v1205_v51, %v1217_v52  ;;  %v4367_v58 = vcombine.low %v1204_v49, %v1216_v50  ;;  %v4369_v59 = vcombine.low %v1205_v51, %v1217_v52 }
 0x5fd   : > { %v1137_v8 = vsel %vm520_vm1, %v1134_v7, 0.0 }
 0x5fe   : > { %1138 = vadd.xlane.f32.xlu0 %v1137_v8  ;;  %v1176_v8 = vld [vmem:[%s6547_s8 + $0x30] sm:$0xff] }
 0x68b   : > { %v1139_v9 = vpop.xlane.xlu0 %1138 }
 0x68c   : > { %v1141_v10 = vmul.f32 0.03125, %v1139_v9  ;;  %v1188_v9 = vld [vmem:[%s6547_s8 + $0x90] sm:$0xff] }
 0x68d   : > { %v4336_v18 = vcombine.high %v1176_v8, %v1188_v9  ;;  %v4335_v16 = vcombine.low %v1176_v8, %v1188_v9  ;;  %v5029_v8 = vld [vmem:[%s6549_s10 + $0x18] sm:$0xff]  }
 0x68e   : > { %v1142_v11 = vsub.f32 %v1134_v7, %v1141_v10  ;;  %v4358_v7 = vcombine.high %v1199_v2, %v1211_v3  ;;  %v1177_v10 = vld [vmem:[%s6547_s8 + $0x38] sm:$0xff] }
 0x68f   : > { %v5030_v9 = vld [vmem:[%s6549_s10 + $0x98] sm:$0xff]  }
 0x690   : > { %v1143_v13 = vmul.f32 %v1142_v11, %v1142_v11 }
 0x692   : > { %v1144_v17 = vsel %vm520_vm1, %v1143_v13, 0.0  ;;  %v4355_v13 = vcombine.low %v1198_v63, %v1210_v0  ;;  %v5019_v63 = vld [vmem:[%s6549_s10 + $0x48] sm:$0xff]  }
 0x693   : > { %1145 = vadd.xlane.f32.xlu1 %v1144_v17  ;;  %v4357_v17 = vcombine.low %v1199_v2, %v1211_v3  ;;  %v5021_v0 = vld [vmem:[%s6549_s10 + $0x8] sm:$0xff]   ;;  %v5023_v3 = vld [vmem:[%s6549_s10 + $0x50] sm:$0xff]  }
 0x694   : > { %v5022_v2 = vld [vmem:[%s6549_s10 + $0x88] sm:$0xff]  }
 0x720   : > { %v1146_v39 = vpop.xlane.xlu1 %1145 }
 0x721   : > { %v1147_v40 = vmul.f32 0.03125, %v1146_v39 }
 0x723   : > { %v1148_v41 = vadd.f32 1e-12, %v1147_v40  ;;  %v4366_v40 = vcombine.high %v1203_v35, %v1215_v36 }
 0x725   : > { %5223 = vrsqrt.f32 %v1148_v41  ;;  %v1180_v41 = vld [vmem:[%s6547_s8 + $0x50] sm:$0xff] }
 0x72f   : > { %v5224_v42 = vpop.eup %5223 }
 0x730   : > { %v1150_v44 = vmul.f32 %v5224_v42, %v1142_v11  ;;  %v1189_v11 = vld [vmem:[%s6547_s8 + $0x98] sm:$0xff]  ;;  %v1192_v42 = vld [vmem:[%s6547_s8 + $0xb0] sm:$0xff] }
 0x731   : > { %v4338_v12 = vcombine.high %v1177_v10, %v1189_v11  ;;  %v4337_v22 = vcombine.low %v1177_v10, %v1189_v11  ;;  %v5031_v10 = vld [vmem:[%s6549_s10 + $0x60] sm:$0xff]  }
 0x732   : > { %v1157_v46 = vmul.f32 %v4321_v43, %v1150_v44  ;;  %v1181_v43 = vld [vmem:[%s6547_s8 + $0x58] sm:$0xff]  ;;  %v5032_v11 = vld [vmem:[%s6549_s10 + $0xe0] sm:$0xff]  }
 0x733   : > { %v1193_v44 = vld [vmem:[%s6547_s8 + $0xb8] sm:$0xff] }
 0x734   : > { %v1164_v47 = vadd.f32 %v4322_v45, %v1157_v46  ;;  %v4365_v46 = vcombine.low %v1203_v35, %v1215_v36  ;;  %v5881_v36 = vld [vmem:[%s6548_s9] sm:$0xff] }
 0x736   : > { %1165 = vst.msk [vmem:[#allocation4] sm:$0xff] %vm520_vm1, %v1164_v47  ;;  %v1166_v48 = vpack.c.bf16 %v1164_v47, %v1164_v47  ;;  %v4344_v47 = vcombine.high %v1180_v41, %v1192_v42 }
 0x738   : > { %1168 = vst.msk [vmem:[#allocation5] sm:$0xf] %vm1167_vm9, %v1166_v48  ;;  %v4346_v48 = vcombine.high %v1181_v43, %v1193_v44 }
 0x73f   : > { %v5632_v57 = vld [vmem:[#allocation5] sm:$0xf] }
 0x740   : > { %4371 = vmatmul.mubr.msk.bf16.vlgmr.msra.gmra.mrb[20].mxu0 %vm520_vm1, %v5632_v57  ;;  %4372 = vmatmul.mubr.msk.bf16.vlgmr.msra.gmra.mrb[20].mxu1 %vm520_vm1, %v5632_v57 }
 0x741   : > { %1671 = vmatpush1.bf16.msra.mxu0 %v4327_v34  ;;  %1712 = vmatpush1.bf16.msra.mxu1 %v4329_v37  ;;  %v1214_v34 = vld [vmem:[%s6547_s8 + $0x160] sm:$0xff]  ;;  %v4339_v37 = vcombine.low %v1178_v25, %v1190_v15  ;;  %v5045_v25 = vld [vmem:[%s6549_s10 + $0x38] sm:$0xff]  }
 0x742   : > { %1672 = vmatprep.subr.bf16.mxu0 %v4352_v53  ;;  %1713 = vmatprep.subr.bf16.mxu1 %v4354_v54  ;;  %v4364_v39 = vcombine.high %v1202_v33, %v1214_v34  ;;  %v4363_v45 = vcombine.low %v1202_v33, %v1214_v34  ;;  %v4343_v53 = vcombine.low %v1180_v41, %v1192_v42  ;;  %v5046_v15 = vld [vmem:[%s6549_s10 + $0xb8] sm:$0xff]  }
 0x743   : > { %1702 = vmatprep.mubr.bf16.mxu0 %v5324_v27  ;;  %1743 = vmatprep.mubr.bf16.mxu1 %v5324_v27  ;;  %v4345_v54 = vcombine.low %v1181_v43, %v1193_v44 }
 0x745   : > { %1673 = vmatpush1.bf16.msra.mxu0 %v4351_v60  ;;  %1714 = vmatpush1.bf16.msra.mxu1 %v4353_v61  ;;  %v5015_v60 = vld [vmem:[%s6549_s10 + $0x40] sm:$0xff]  }
 0x746   : > { %1752 = vmatprep.subr.bf16.mxu0 %v4332_v1  ;;  %1793 = vmatprep.subr.bf16.mxu1 %v4334_v62  ;;  %v5016_v61 = vld [vmem:[%s6549_s10 + $0xc0] sm:$0xff]  }
 0x747   : > { %v5017_v1 = vld [vmem:[%s6549_s10] sm:$0xff]  }
 0x748   : > { %4373 = vmatmul.mubr.msk.bf16.vlgmr.msra.gmra.mrb[24].mxu0 %vm520_vm1, %v5632_v57  ;;  %4374 = vmatmul.mubr.msk.bf16.vlgmr.msra.gmra.mrb[24].mxu1 %vm520_vm1, %v5632_v57  ;;  %v5018_v62 = vld [vmem:[%s6549_s10 + $0x80] sm:$0xff]  }
 0x749   : > { %1753 = vmatpush1.bf16.msra.mxu0 %v4331_v4  ;;  %1794 = vmatpush1.bf16.msra.mxu1 %v4333_v5  ;;  %v5025_v4 = vld [vmem:[%s6549_s10 + $0x10] sm:$0xff]  }
 0x74a   : > { %1754 = vmatprep.subr.bf16.mxu0 %v4356_v6  ;;  %1795 = vmatprep.subr.bf16.mxu1 %v4358_v7  ;;  %v5026_v5 = vld [vmem:[%s6549_s10 + $0x90] sm:$0xff]   ;;  %v5027_v6 = vld [vmem:[%s6549_s10 + $0x58] sm:$0xff]  }
 0x74b   : > { %1784 = vmatprep.mubr.bf16.mxu0 %v5324_v27  ;;  %1825 = vmatprep.mubr.bf16.mxu1 %v5324_v27  ;;  %v5028_v7 = vld [vmem:[%s6549_s10 + $0xd8] sm:$0xff]  }
 0x74d   : > { %1755 = vmatpush1.bf16.msra.mxu0 %v4355_v13  ;;  %1796 = vmatpush1.bf16.msra.mxu1 %v4357_v17  ;;  %v5033_v13 = vld [vmem:[%s6549_s10 + $0x20] sm:$0xff]  }
 0x74e   : > { %1834 = vmatprep.subr.bf16.mxu0 %v4336_v18  ;;  %1875 = vmatprep.subr.bf16.mxu1 %v4338_v12  ;;  %v5034_v17 = vld [vmem:[%s6549_s10 + $0xa0] sm:$0xff]   ;;  %v5035_v18 = vld [vmem:[%s6549_s10 + $0x68] sm:$0xff]  }
 0x74f   : > { %v5036_v12 = vld [vmem:[%s6549_s10 + $0xe8] sm:$0xff]  }
 0x750   : > { %4375 = vmatmul.mubr.msk.bf16.vlgmr.msra.gmra.mrb[28].mxu0 %vm520_vm1, %v5632_v57  ;;  %4376 = vmatmul.mubr.msk.bf16.vlgmr.msra.gmra.mrb[28].mxu1 %vm520_vm1, %v5632_v57 }
 0x751   : > { %1835 = vmatpush1.bf16.msra.mxu0 %v4335_v16  ;;  %1876 = vmatpush1.bf16.msra.mxu1 %v4337_v22  ;;  %v5041_v16 = vld [vmem:[%s6549_s10 + $0x30] sm:$0xff]  }
 0x752   : > { %1836 = vmatprep.subr.bf16.mxu0 %v4360_v23  ;;  %1877 = vmatprep.subr.bf16.mxu1 %v4362_v24  ;;  %v5042_v22 = vld [vmem:[%s6549_s10 + $0xb0] sm:$0xff]   ;;  %v5043_v23 = vld [vmem:[%s6549_s10 + $0x78] sm:$0xff]  }
 0x753   : > { %1866 = vmatprep.mubr.bf16.mxu0 %v5324_v27  ;;  %1907 = vmatprep.mubr.bf16.mxu1 %v5324_v27  ;;  %v5044_v24 = vld [vmem:[%s6549_s10 + $0xf8] sm:$0xff]  }
 0x755   : > { %1837 = vmatpush1.bf16.msra.mxu0 %v4359_v29  ;;  %1878 = vmatpush1.bf16.msra.mxu1 %v4361_v30  ;;  %v1224_v29 = vlaneseq }
 0x756   : > { %1916 = vmatprep.subr.bf16.mxu0 %v4340_v31  ;;  %1957 = vmatprep.subr.bf16.mxu1 %v4342_v32  ;;  %v5868_v32 = vld [vmem:[%s6548_s9 + $0x8] sm:$0xff] }
 0x757   : > { %v5860_v30 = vshrl.u32 %v1224_v29, 7  ;;  %v5060_v29 = vld [vmem:[%s6549_s10 + $0x1d8] sm:$0xff]  }
 0x758   : > { %4377 = vmatmul.mubr.msk.bf16.vlgmr.msra.gmra.mrb[32].mxu0 %vm520_vm1, %v5632_v57  ;;  %4378 = vmatmul.mubr.msk.bf16.vlgmr.msra.gmra.mrb[32].mxu1 %vm520_vm1, %v5632_v57 }
 0x759   : > { %1917 = vmatpush1.bf16.msra.mxu0 %v4339_v37  ;;  %1958 = vmatpush1.bf16.msra.mxu1 %v4341_v38  ;;  %v5863_v31 = vsub.s32 6, %v5860_v30  ;;  %v5873_v34 = vsub.s32 0, %v5860_v30  ;;  %v5876_v35 = vsub.s32 2, %v5860_v30  ;;  %v5884_v37 = vsub.s32 1, %v5860_v30 }
 0x75a   : > { %1918 = vmatprep.subr.bf16.mxu0 %v4364_v39  ;;  %1959 = vmatprep.subr.bf16.mxu1 %v4366_v40  ;;  %v5887_v38 = vsub.s32 3, %v5860_v30 }
 0x75b   : > { %1948 = vmatprep.mubr.bf16.mxu0 %v5324_v27  ;;  %1989 = vmatprep.mubr.bf16.mxu1 %v5324_v27  ;;  %v1283_v33 = vrot.slane %v5868_v32, %v5863_v31  ;;  %v1227_v39 = vrot.slane %v5881_v36, %v5873_v34  ;;  %v1235_v40 = vrot.slane %v5881_v36, %v5876_v35 }
 0x75c   : > { %v1231_v41 = vrot.slane %v5881_v36, %v5884_v37  ;;  %v1239_v42 = vrot.slane %v5881_v36, %v5887_v38 }
 0x75d   : > { %1919 = vmatpush1.bf16.msra.mxu0 %v4363_v45  ;;  %1960 = vmatpush1.bf16.msra.mxu1 %v4365_v46 }
 0x75e   : > { %1998 = vmatprep.subr.bf16.mxu0 %v4344_v47  ;;  %2039 = vmatprep.subr.bf16.mxu1 %v4346_v48 }
 0x760   : > { %4379 = vmatmul.mubr.msk.bf16.vlgmr.msra.gmra.mrb[36].mxu0 %vm520_vm1, %v5632_v57  ;;  %4380 = vmatmul.mubr.msk.bf16.vlgmr.msra.gmra.mrb[36].mxu1 %vm520_vm1, %v5632_v57 }
 0x761   : > { %1999 = vmatpush1.bf16.msra.mxu0 %v4343_v53  ;;  %2040 = vmatpush1.bf16.msra.mxu1 %v4345_v54  ;;  %v5898_v53 = vsub.s32 5, %v5860_v30  ;;  %v5901_v54 = vsub.s32 7, %v5860_v30 }
 0x762   : > { %2000 = vmatprep.subr.bf16.mxu0 %v4368_v55  ;;  %2041 = vmatprep.subr.bf16.mxu1 %v4370_v56 }
 0x763   : > { %2030 = vmatprep.mubr.bf16.mxu0 %v5324_v27  ;;  %2071 = vmatprep.mubr.bf16.mxu1 %v5324_v27  ;;  %v5020_v27 = vld [vmem:[%s6549_s10 + $0xc8] sm:$0xff]  }
 0x765   : > { %2001 = vmatpush1.bf16.msra.mxu0 %v4367_v58  ;;  %2042 = vmatpush1.bf16.msra.mxu1 %v4369_v59 }
 0x766   : > { %4607 = vmatprep.subr.bf16.mxu0 %v5015_v60  ;;  %4629 = vmatprep.subr.bf16.mxu1 %v5016_v61 }
 0x768   : > { %4381 = vmatmul.mubr.msk.bf16.vlgmr.msra.gmra.mrb[40].mxu0 %vm520_vm1, %v5632_v57  ;;  %4382 = vmatmul.mubr.msk.bf16.vlgmr.msra.gmra.mrb[40].mxu1 %vm520_vm1, %v5632_v57  ;;  %v5024_v57 = vld [vmem:[%s6549_s10 + $0xd0] sm:$0xff]  }
 0x769   : > { %4608 = vmatpush3.bf16.msra.mxu0 %v5017_v1  ;;  %4630 = vmatpush3.bf16.msra.mxu1 %v5018_v62 }
 0x76a   : > { %4609 = vmatprep.subr.bf16.mxu0 %v5019_v63  ;;  %4631 = vmatprep.subr.bf16.mxu1 %v5020_v27  ;;  %v1247_v63 = vrot.slane %v5881_v36, %v5898_v53  ;;  %v1255_v27 = vrot.slane %v5881_v36, %v5901_v54 }
 0x76d   : > { %4610 = vmatpush3.bf16.msra.mxu0 %v5021_v0  ;;  %4632 = vmatpush3.bf16.msra.mxu1 %v5022_v2  ;;  %v5049_v0 = vld [vmem:[%s6549_s10 + $0x100] sm:$0xff]  }
 0x76e   : > { %4611 = vmatprep.subr.bf16.mxu0 %v5023_v3  ;;  %4633 = vmatprep.subr.bf16.mxu1 %v5024_v57  ;;  %v5050_v2 = vld [vmem:[%s6549_s10 + $0x180] sm:$0xff]  }
 0x771   : > { %4612 = vmatpush3.bf16.msra.mxu0 %v5025_v4  ;;  %4634 = vmatpush3.bf16.msra.mxu1 %v5026_v5  ;;  %v5051_v4 = vld [vmem:[%s6549_s10 + $0x148] sm:$0xff]  }
 0x772   : > { %4613 = vmatprep.subr.bf16.mxu0 %v5027_v6  ;;  %4635 = vmatprep.subr.bf16.mxu1 %v5028_v7  ;;  %v5052_v5 = vld [vmem:[%s6549_s10 + $0x1c8] sm:$0xff]  }
 0x775   : > { %4614 = vmatpush3.bf16.msra.mxu0 %v5029_v8  ;;  %4636 = vmatpush3.bf16.msra.mxu1 %v5030_v9 }
 0x776   : > { %4615 = vmatprep.subr.bf16.mxu0 %v5031_v10  ;;  %4637 = vmatprep.subr.bf16.mxu1 %v5032_v11 }
 0x779   : > { %4616 = vmatpush3.bf16.msra.mxu0 %v5033_v13  ;;  %4638 = vmatpush3.bf16.msra.mxu1 %v5034_v17 }
 0x77a   : > { %4617 = vmatprep.subr.bf16.mxu0 %v5035_v18  ;;  %4639 = vmatprep.subr.bf16.mxu1 %v5036_v12  ;;  %v5053_v18 = vld [vmem:[%s6549_s10 + $0x108] sm:$0xff]  }
 0x77b   : > { %v5054_v12 = vld [vmem:[%s6549_s10 + $0x188] sm:$0xff]  }
 0x77d   : > { %4618 = vmatpush3.bf16.msra.mxu0 %v5037_v19  ;;  %4640 = vmatpush3.bf16.msra.mxu1 %v5038_v20 }
 0x77e   : > { %4619 = vmatprep.subr.bf16.mxu0 %v5039_v14  ;;  %4641 = vmatprep.subr.bf16.mxu1 %v5040_v21  ;;  %v5055_v14 = vld [vmem:[%s6549_s10 + $0x150] sm:$0xff]  }
 0x77f   : > { %v5056_v21 = vld [vmem:[%s6549_s10 + $0x1d0] sm:$0xff]  }
 0x781   : > { %4620 = vmatpush3.bf16.msra.mxu0 %v5041_v16  ;;  %4642 = vmatpush3.bf16.msra.mxu1 %v5042_v22 }
 0x782   : > { %4621 = vmatprep.subr.bf16.mxu0 %v5043_v23  ;;  %4643 = vmatprep.subr.bf16.mxu1 %v5044_v24  ;;  %v1267_v23 = vrot.slane %v5868_v32, %v5876_v35 }
 0x785   : > { %4622 = vmatpush3.bf16.msra.mxu0 %v5045_v25  ;;  %4644 = vmatpush3.bf16.msra.mxu1 %v5046_v15  ;;  %v5057_v15 = vld [vmem:[%s6549_s10 + $0x110] sm:$0xff]  }
 0x786   : > { %4651 = vmatprep.subr.bf16.mxu0 %v5047_v26  ;;  %4673 = vmatprep.subr.bf16.mxu1 %v5048_v28  ;;  %v5058_v26 = vld [vmem:[%s6549_s10 + $0x190] sm:$0xff]   ;;  %v5059_v28 = vld [vmem:[%s6549_s10 + $0x158] sm:$0xff]  }
 0x813   : > { %v1622_v43 = vpop.f32.mrb[20].mxu0  ;;  %v1663_v44 = vpop.f32.mrb[20].mxu1 }
 0x814   : > { %v1623_v45 = vadd.f32 %v1622_v43, %v1227_v39  ;;  %v1664_v46 = vadd.f32 %v1663_v44, %v1235_v40  ;;  %v1624_v47 = vpop.f32.mrb[21].mxu0  ;;  %v1665_v48 = vpop.f32.mrb[21].mxu1 }
 0x815   : > { %v1625_v49 = vadd.f32 %v1624_v47, %v1231_v41  ;;  %v1666_v50 = vadd.f32 %v1665_v48, %v1239_v42  ;;  %v1626_v51 = vpop.f32.mrb[22].mxu0  ;;  %v1667_v52 = vpop.f32.mrb[22].mxu1  ;;  %v5062_v47 = vld [vmem:[%s6549_s10 + $0x198] sm:$0xff]   ;;  %v5960_v48 = vsub.s32 4, %v5860_v30  ;;  %v5065_v30 = vld [vmem:[%s6549_s10 + $0x120] sm:$0xff]  }
 0x816   : > { %v2080_v55 = vmax.f32 %v1623_v45, 0.0  ;;  %v2082_v56 = vmax.f32 %v1664_v46, 0.0  ;;  %v1627_v58 = vpop.f32.mrb[23].mxu0  ;;  %v1668_v59 = vpop.f32.mrb[23].mxu1  ;;  %v5061_v46 = vld [vmem:[%s6549_s10 + $0x118] sm:$0xff]   ;;  %v5063_v51 = vld [vmem:[%s6549_s10 + $0x160] sm:$0xff]  }
 0x817   : > { %v2081_v60 = vmax.f32 %v1625_v49, 0.0  ;;  %v2083_v61 = vmax.f32 %v1666_v50, 0.0  ;;  %v5064_v52 = vld [vmem:[%s6549_s10 + $0x1e0] sm:$0xff]   ;;  %v5067_v58 = vld [vmem:[%s6549_s10 + $0x168] sm:$0xff]  }
 0x818   : > { %v2104_v3 = vpack.c.bf16 %v2080_v55, %v2080_v55  ;;  %v2106_v57 = vpack.c.bf16 %v2082_v56, %v2082_v56  ;;  %v1275_v55 = vrot.slane %v5868_v32, %v5960_v48  ;;  %v5066_v56 = vld [vmem:[%s6549_s10 + $0x1a0] sm:$0xff]   ;;  %v5068_v59 = vld [vmem:[%s6549_s10 + $0x1e8] sm:$0xff]  }
 0x819   : > { %v2105_v1 = vpack.c.bf16 %v2081_v60, %v2081_v60  ;;  %v2107_v62 = vpack.c.bf16 %v2083_v61, %v2083_v61 }
 0x81b   : > { %v5919_v6 = vpop.f32.mrb[24].mxu0  ;;  %v5921_v7 = vpop.f32.mrb[24].mxu1  ;;  %3696 = vmatprep.mubr.bf16.mxu0 %v2105_v1  ;;  %3736 = vmatprep.mubr.bf16.mxu1 %v2107_v62 }
 0x81c   : > { %v1706_v8 = vpop.f32.mrb[25].mxu0  ;;  %v1747_v9 = vpop.f32.mrb[25].mxu1  ;;  %3697 = vmatmul.mubr.bf16.vlgmr.msra.gmra.mrb[44].mxu0 %v2104_v3  ;;  %3737 = vmatmul.mubr.bf16.vlgmr.msra.gmra.mrb[44].mxu1 %v2106_v57  ;;  %v5069_v3 = vld [vmem:[%s6549_s10 + $0x128] sm:$0xff]  }
 0x81d   : > { %v1707_v10 = vadd.f32 %v1706_v8, %v1247_v63  ;;  %v1748_v11 = vadd.f32 %v1747_v9, %v1255_v27  ;;  %4652 = vmatpush3.bf16.msra.mxu0 %v5049_v0  ;;  %4674 = vmatpush3.bf16.msra.mxu1 %v5050_v2  ;;  %v1708_v13 = vpop.f32.mrb[26].mxu0  ;;  %v1749_v17 = vpop.f32.mrb[26].mxu1  ;;  %v5070_v57 = vld [vmem:[%s6549_s10 + $0x1a8] sm:$0xff]  }
 0x81e   : > { %v1709_v19 = vpop.f32.mrb[27].mxu0  ;;  %v1750_v20 = vpop.f32.mrb[27].mxu1  ;;  %4653 = vmatprep.subr.bf16.mxu0 %v5051_v4  ;;  %4675 = vmatprep.subr.bf16.mxu1 %v5052_v5  ;;  %v1243_v4 = vrot.slane %v5881_v36, %v5960_v48  ;;  %v1251_v5 = vrot.slane %v5881_v36, %v5863_v31  ;;  %v1263_v13 = vrot.slane %v5868_v32, %v5884_v37 }
 0x81f   : > { %v2085_v16 = vmax.f32 %v1707_v10, 0.0  ;;  %v2087_v22 = vmax.f32 %v1748_v11, 0.0  ;;  %v5071_v10 = vld [vmem:[%s6549_s10 + $0x170] sm:$0xff]   ;;  %v1271_v17 = vrot.slane %v5868_v32, %v5887_v38 }
 0x820   : > { %v5072_v11 = vld [vmem:[%s6549_s10 + $0x1f0] sm:$0xff]  }
 0x821   : > { %v2109_v24 = vpack.c.bf16 %v2085_v16, %v2085_v16  ;;  %v2111_v25 = vpack.c.bf16 %v2087_v22, %v2087_v22  ;;  %4654 = vmatpush3.bf16.msra.mxu0 %v5053_v18  ;;  %4676 = vmatpush3.bf16.msra.mxu1 %v5054_v12  ;;  %v5073_v19 = vld [vmem:[%s6549_s10 + $0x130] sm:$0xff]  }
 0x822   : > { %4655 = vmatprep.subr.bf16.mxu0 %v5055_v14  ;;  %4677 = vmatprep.subr.bf16.mxu1 %v5056_v21  ;;  %v5074_v20 = vld [vmem:[%s6549_s10 + $0x1b0] sm:$0xff]   ;;  %v1705_v14 = vadd.f32 %v5919_v6, %v1243_v4 }
 0x823   : > { %v5949_v39 = vpop.f32.mrb[28].mxu0  ;;  %v1827_v40 = vpop.f32.mrb[28].mxu1  ;;  %3776 = vmatprep.mubr.bf16.mxu0 %v2109_v24  ;;  %3816 = vmatprep.mubr.bf16.mxu1 %v2111_v25 }
 0x824   : > { %v5951_v41 = vadd.f32 %v1827_v40, %v1267_v23  ;;  %v1788_v42 = vpop.f32.mrb[29].mxu0  ;;  %v1829_v43 = vpop.f32.mrb[29].mxu1  ;;  %v5078_v40 = vld [vmem:[%s6549_s10 + $0x1b8] sm:$0xff]  }
 0x825   : > { %4656 = vmatpush3.bf16.msra.mxu0 %v5057_v15  ;;  %4678 = vmatpush3.bf16.msra.mxu1 %v5058_v26  ;;  %v1790_v44 = vpop.f32.mrb[30].mxu0  ;;  %v1831_v45 = vpop.f32.mrb[30].mxu1  ;;  %v1789_v21 = vadd.f32 %v1788_v42, %v1263_v13  ;;  %v1830_v23 = vadd.f32 %v1829_v43, %v1271_v17  ;;  %v2084_v42 = vmax.f32 %v1705_v14, 0.0  ;;  %v5085_v17 = vld [vmem:[%s6549_s10 + $0x208] sm:$0xff]   ;;  %v5089_v14 = vld [vmem:[%s6549_s10 + $0x210] sm:$0xff]  }
 0x826   : > { %v1791_v49 = vpop.f32.mrb[31].mxu0  ;;  %v1832_v50 = vpop.f32.mrb[31].mxu1  ;;  %4657 = vmatprep.subr.bf16.mxu0 %v5059_v28  ;;  %4679 = vmatprep.subr.bf16.mxu1 %v5060_v29  ;;  %v5077_v29 = vld [vmem:[%s6549_s10 + $0x138] sm:$0xff]  }
 0x827   : > { %v2089_v49 = vmax.f32 %v1789_v21, 0.0  ;;  %v2091_v50 = vmax.f32 %v1830_v23, 0.0  ;;  %v5093_v21 = vld [vmem:[%s6549_s10 + $0x218] sm:$0xff]   ;;  %v5095_v23 = vld [vmem:[%s6549_s10 + $0x260] sm:$0xff]  }
 0x829   : > { %4658 = vmatpush3.bf16.msra.mxu0 %v5061_v46  ;;  %4680 = vmatpush3.bf16.msra.mxu1 %v5062_v47  ;;  %v5079_v46 = vld [vmem:[%s6549_s10 + $0x240] sm:$0xff]  }
 0x82a   : > { %4659 = vmatprep.subr.bf16.mxu0 %v5063_v51  ;;  %4681 = vmatprep.subr.bf16.mxu1 %v5064_v52  ;;  %v5080_v47 = vld [vmem:[%s6549_s10 + $0x2c0] sm:$0xff]  }
 0x82b   : > { %v1868_v60 = vpop.f32.mrb[32].mxu0  ;;  %v1909_v61 = vpop.f32.mrb[32].mxu1 }
 0x82c   : > { %v5982_v1 = vadd.f32 %v1868_v60, %v1275_v55  ;;  %v5987_v62 = vadd.f32 %v1909_v61, %v1283_v33  ;;  %v5989_v63 = vpop.f32.mrb[33].mxu0  ;;  %v5991_v27 = vpop.f32.mrb[33].mxu1  ;;  %v6002_v33 = vld [vmem:[%s6548_s9 + $0x10] sm:$0xff] }
 0x82d   : > { %4660 = vmatpush3.bf16.msra.mxu0 %v5065_v30  ;;  %4682 = vmatpush3.bf16.msra.mxu1 %v5066_v56  ;;  %v1872_v0 = vpop.f32.mrb[34].mxu0  ;;  %v1913_v2 = vpop.f32.mrb[34].mxu1  ;;  %v1299_v36 = vrot.slane %v6002_v33, %v5876_v35  ;;  %v1295_v18 = vrot.slane %v6002_v33, %v5884_v37  ;;  %v1303_v12 = vrot.slane %v6002_v33, %v5887_v38  ;;  %v5075_v37 = vld [vmem:[%s6549_s10 + $0x178] sm:$0xff]   ;;  %v5081_v56 = vld [vmem:[%s6549_s10 + $0x200] sm:$0xff]  }
 0x82e   : > { %v1873_v8 = vpop.f32.mrb[35].mxu0  ;;  %v1914_v9 = vpop.f32.mrb[35].mxu1  ;;  %4661 = vmatprep.subr.bf16.mxu0 %v5067_v58  ;;  %4683 = vmatprep.subr.bf16.mxu1 %v5068_v59  ;;  %v1746_v35 = vadd.f32 %v5921_v7, %v1251_v5  ;;  %v5076_v38 = vld [vmem:[%s6549_s10 + $0x1f8] sm:$0xff]   ;;  %v1307_v51 = vrot.slane %v6002_v33, %v5960_v48  ;;  %v1315_v52 = vrot.slane %v6002_v33, %v5863_v31  ;;  %v5082_v31 = vld [vmem:[%s6549_s10 + $0x280] sm:$0xff]   ;;  %v5083_v0 = vld [vmem:[%s6549_s10 + $0x248] sm:$0xff]  }
 0x82f   : > { %v1311_v55 = vrot.slane %v6002_v33, %v5898_v53  ;;  %v1319_v30 = vrot.slane %v6002_v33, %v5901_v54  ;;  %v2108_v58 = vpack.c.bf16 %v2084_v42, %v2084_v42  ;;  %v2113_v48 = vpack.c.bf16 %v2089_v49, %v2089_v49  ;;  %v5084_v2 = vld [vmem:[%s6549_s10 + $0x2c8] sm:$0xff]   ;;  %v5105_v49 = vld [vmem:[%s6549_s10 + $0x230] sm:$0xff]  }
 0x830   : > { %v2086_v43 = vmax.f32 %v1746_v35, 0.0  ;;  %v5090_v35 = vld [vmem:[%s6549_s10 + $0x290] sm:$0xff]   ;;  %v1259_v42 = vrot.slane %v5868_v32, %v5873_v34 }
 0x831   : > { %4662 = vmatpush3.bf16.msra.mxu0 %v5069_v3  ;;  %4684 = vmatpush3.bf16.msra.mxu1 %v5070_v57  ;;  %v2115_v3 = vpack.c.bf16 %v2091_v50, %v2091_v50 }
 0x832   : > { %4663 = vmatprep.subr.bf16.mxu0 %v5071_v10  ;;  %4685 = vmatprep.subr.bf16.mxu1 %v5072_v11  ;;  %v2110_v59 = vpack.c.bf16 %v2086_v43, %v2086_v43  ;;  %v5102_v43 = vld [vmem:[%s6549_s10 + $0x2a8] sm:$0xff]   ;;  %v1787_v50 = vadd.f32 %v5949_v39, %v1259_v42  ;;  %v5109_v39 = vld [vmem:[%s6549_s10 + $0x238] sm:$0xff]  }
 0x833   : > { %v6038_v16 = vpop.f32.mrb[36].mxu0  ;;  %v1991_v22 = vpop.f32.mrb[36].mxu1  ;;  %v5140_v42 = vld [vmem:[%s6549_s10 + $0x3f8] sm:$0xff]  }
 0x834   : > { %v6040_v24 = vadd.f32 %v1991_v22, %v1299_v36  ;;  %v1952_v6 = vpop.f32.mrb[37].mxu0  ;;  %v1993_v25 = vpop.f32.mrb[37].mxu1  ;;  %v5094_v22 = vld [vmem:[%s6549_s10 + $0x298] sm:$0xff]  }
 0x835   : > { %v6042_v7 = vadd.f32 %v1952_v6, %v1295_v18  ;;  %v6044_v15 = vadd.f32 %v1993_v25, %v1303_v12  ;;  %4664 = vmatpush3.bf16.msra.mxu0 %v5073_v19  ;;  %4686 = vmatpush3.bf16.msra.mxu1 %v5074_v20  ;;  %v1954_v26 = vpop.f32.mrb[38].mxu0  ;;  %v1995_v28 = vpop.f32.mrb[38].mxu1  ;;  %v5086_v12 = vld [vmem:[%s6549_s10 + $0x288] sm:$0xff]   ;;  %v5087_v19 = vld [vmem:[%s6549_s10 + $0x250] sm:$0xff]   ;;  %v5096_v6 = vld [vmem:[%s6549_s10 + $0x2e0] sm:$0xff]  }
 0x836   : > { %v1955_v44 = vpop.f32.mrb[39].mxu0  ;;  %v1996_v45 = vpop.f32.mrb[39].mxu1  ;;  %4665 = vmatprep.subr.bf16.mxu0 %v5075_v37  ;;  %4687 = vmatprep.subr.bf16.mxu1 %v5076_v38  ;;  %v5088_v20 = vld [vmem:[%s6549_s10 + $0x2d0] sm:$0xff]   ;;  %v5091_v37 = vld [vmem:[%s6549_s10 + $0x258] sm:$0xff]   ;;  %v5097_v25 = vld [vmem:[%s6549_s10 + $0x220] sm:$0xff]  }
 0x837   : > { %v5092_v38 = vld [vmem:[%s6549_s10 + $0x2d8] sm:$0xff]   ;;  %v5098_v26 = vld [vmem:[%s6549_s10 + $0x2a0] sm:$0xff]   ;;  %v5099_v28 = vld [vmem:[%s6549_s10 + $0x268] sm:$0xff]  }
 0x838   : > { %v5103_v44 = vld [vmem:[%s6549_s10 + $0x270] sm:$0xff]  }
 0x839   : > { %4666 = vmatpush3.bf16.msra.mxu0 %v5077_v29  ;;  %4688 = vmatpush3.bf16.msra.mxu1 %v5078_v40  ;;  %v5100_v29 = vld [vmem:[%s6549_s10 + $0x2e8] sm:$0xff]   ;;  %v5104_v45 = vld [vmem:[%s6549_s10 + $0x2f0] sm:$0xff]  }
 0x83a   : > { %4695 = vmatprep.subr.bf16.mxu0 %v5079_v46  ;;  %4717 = vmatprep.subr.bf16.mxu1 %v5080_v47  ;;  %v5101_v40 = vld [vmem:[%s6549_s10 + $0x228] sm:$0xff]   ;;  %v1279_v46 = vrot.slane %v5868_v32, %v5898_v53  ;;  %v1287_v47 = vrot.slane %v5868_v32, %v5901_v54  ;;  %v5107_v53 = vld [vmem:[%s6549_s10 + $0x278] sm:$0xff]  }
 0x83b   : > { %v2032_v60 = vpop.f32.mrb[40].mxu0  ;;  %v2073_v61 = vpop.f32.mrb[40].mxu1  ;;  %v5108_v32 = vld [vmem:[%s6549_s10 + $0x2f8] sm:$0xff]  }
 0x83c   : > { %v6078_v57 = vadd.f32 %v2032_v60, %v1307_v51  ;;  %v6080_v4 = vadd.f32 %v2073_v61, %v1315_v52  ;;  %3777 = vmatmul.mubr.bf16.vlgmr.msra.gmra.mrb[48].mxu0 %v2108_v58  ;;  %3817 = vmatmul.mubr.bf16.vlgmr.msra.gmra.mrb[48].mxu1 %v2110_v59  ;;  %v2034_v5 = vpop.f32.mrb[41].mxu0  ;;  %v2075_v8 = vpop.f32.mrb[41].mxu1  ;;  %v5106_v51 = vld [vmem:[%s6549_s10 + $0x2b0] sm:$0xff]   ;;  %v1871_v54 = vadd.f32 %v5989_v63, %v1279_v46  ;;  %v2090_v63 = vmax.f32 %v5951_v41, 0.0  ;;  %v5114_v60 = vld [vmem:[%s6549_s10 + $0x380] sm:$0xff]   ;;  %v5115_v61 = vld [vmem:[%s6549_s10 + $0x348] sm:$0xff]  }
 0x83d   : > { %v6082_v9 = vadd.f32 %v2034_v5, %v1311_v55  ;;  %v6084_v10 = vadd.f32 %v2075_v8, %v1319_v30  ;;  %4696 = vmatpush3.bf16.msra.mxu0 %v5081_v56  ;;  %3856 = vmatprep.mubr.bf16.mxu0 %v2113_v48  ;;  %v2036_v11 = vpop.f32.mrb[42].mxu0  ;;  %v2077_v13 = vpop.f32.mrb[42].mxu1  ;;  %v1912_v52 = vadd.f32 %v5991_v27, %v1287_v47  ;;  %v2088_v55 = vmax.f32 %v1787_v50, 0.0  ;;  %v5110_v30 = vld [vmem:[%s6549_s10 + $0x2b8] sm:$0xff]   ;;  %v5111_v56 = vld [vmem:[%s6549_s10 + $0x340] sm:$0xff]   ;;  %v5117_v5 = vld [vmem:[%s6549_s10 + $0x308] sm:$0xff]  }
 0x83e   : > { %4718 = vmatpush3.bf16.msra.mxu1 %v5082_v31  ;;  %3896 = vmatprep.mubr.bf16.mxu1 %v2115_v3  ;;  %v2037_v36 = vpop.f32.mrb[43].mxu0  ;;  %v2078_v18 = vpop.f32.mrb[43].mxu1  ;;  %v5112_v27 = vld [vmem:[%s6549_s10 + $0x3c0] sm:$0xff]   ;;  %v2093_v58 = vmax.f32 %v1871_v54, 0.0  ;;  %v2114_v41 = vpack.c.bf16 %v2090_v63, %v2090_v63  ;;  %v5118_v8 = vld [vmem:[%s6549_s10 + $0x388] sm:$0xff]   ;;  %v5119_v11 = vld [vmem:[%s6549_s10 + $0x350] sm:$0xff]  }
 0x83f   : > { %4697 = vmatprep.subr.bf16.mxu0 %v5083_v0  ;;  %4719 = vmatprep.subr.bf16.mxu1 %v5084_v2  ;;  %v2095_v59 = vmax.f32 %v1912_v52, 0.0  ;;  %v5113_v31 = vld [vmem:[%s6549_s10 + $0x300] sm:$0xff]   ;;  %v2112_v48 = vpack.c.bf16 %v2088_v55, %v2088_v55  ;;  %v5116_v2 = vld [vmem:[%s6549_s10 + $0x3c8] sm:$0xff]   ;;  %v5120_v13 = vld [vmem:[%s6549_s10 + $0x3d0] sm:$0xff]   ;;  %v2094_v47 = vmax.f32 %v5987_v62, 0.0  ;;  %v2097_v50 = vmax.f32 %v6042_v7, 0.0 }
 0x840   : > { %v2117_v0 = vpack.c.bf16 %v2093_v58, %v2093_v58  ;;  %v5122_v36 = vld [vmem:[%s6549_s10 + $0x390] sm:$0xff]   ;;  %v5123_v18 = vld [vmem:[%s6549_s10 + $0x358] sm:$0xff]   ;;  %v5143_v46 = vld [vmem:[%s6549_s10 + $0x440] sm:$0xff]  }
 0x841   : > { %4698 = vmatpush3.bf16.msra.mxu0 %v5085_v17  ;;  %v2119_v3 = vpack.c.bf16 %v2095_v59, %v2095_v59  ;;  %v5121_v17 = vld [vmem:[%s6549_s10 + $0x310] sm:$0xff]   ;;  %v5146_v62 = vld [vmem:[%s6549_s10 + $0x480] sm:$0xff]   ;;  %v5147_v7 = vld [vmem:[%s6549_s10 + $0x448] sm:$0xff]   ;;  %v2121_v54 = vpack.c.bf16 %v2097_v50, %v2097_v50 }
 0x842   : > { %4720 = vmatpush3.bf16.msra.mxu1 %v5086_v12  ;;  %4699 = vmatprep.subr.bf16.mxu0 %v5087_v19  ;;  %v5124_v12 = vld [vmem:[%s6549_s10 + $0x3d8] sm:$0xff]   ;;  %v5150_v55 = vld [vmem:[%s6549_s10 + $0x488] sm:$0xff]   ;;  %v5153_v63 = vld [vmem:[%s6549_s10 + $0x410] sm:$0xff]  }
 0x843   : > { %4721 = vmatprep.subr.bf16.mxu1 %v5088_v20  ;;  %v5125_v19 = vld [vmem:[%s6549_s10 + $0x318] sm:$0xff]   ;;  %v5191_v50 = vld [vmem:[%s6549_s10 + $0x560] sm:$0xff]  }
 0x844   : > { %v5126_v20 = vld [vmem:[%s6549_s10 + $0x398] sm:$0xff]  }
 0x845   : > { %4700 = vmatpush3.bf16.msra.mxu0 %v5089_v14  ;;  %v5127_v14 = vld [vmem:[%s6549_s10 + $0x360] sm:$0xff]   ;;  %v5155_v58 = vld [vmem:[%s6549_s10 + $0x458] sm:$0xff]  }
 0x846   : > { %4722 = vmatpush3.bf16.msra.mxu1 %v5090_v35  ;;  %4701 = vmatprep.subr.bf16.mxu0 %v5091_v37  ;;  %v5128_v35 = vld [vmem:[%s6549_s10 + $0x3e0] sm:$0xff]   ;;  %v5156_v59 = vld [vmem:[%s6549_s10 + $0x4d8] sm:$0xff]  }
 0x847   : > { %4723 = vmatprep.subr.bf16.mxu1 %v5092_v38  ;;  %v5129_v37 = vld [vmem:[%s6549_s10 + $0x320] sm:$0xff]  }
 0x848   : > { %v5130_v38 = vld [vmem:[%s6549_s10 + $0x3a0] sm:$0xff]  }
 0x849   : > { %4702 = vmatpush3.bf16.msra.mxu0 %v5093_v21  ;;  %v5131_v21 = vld [vmem:[%s6549_s10 + $0x368] sm:$0xff]  }
 0x84a   : > { %4724 = vmatpush3.bf16.msra.mxu1 %v5094_v22  ;;  %4703 = vmatprep.subr.bf16.mxu0 %v5095_v23  ;;  %v5132_v22 = vld [vmem:[%s6549_s10 + $0x3e8] sm:$0xff]  }
 0x84b   : > { %4725 = vmatprep.subr.bf16.mxu1 %v5096_v6  ;;  %v5133_v23 = vld [vmem:[%s6549_s10 + $0x328] sm:$0xff]  }
 0x84c   : > { %v5134_v6 = vld [vmem:[%s6549_s10 + $0x3a8] sm:$0xff]  }
 0x84d   : > { %4704 = vmatpush3.bf16.msra.mxu0 %v5097_v25  ;;  %v5135_v25 = vld [vmem:[%s6549_s10 + $0x370] sm:$0xff]  }
 0x84e   : > { %4726 = vmatpush3.bf16.msra.mxu1 %v5098_v26  ;;  %4705 = vmatprep.subr.bf16.mxu0 %v5099_v28  ;;  %v5136_v26 = vld [vmem:[%s6549_s10 + $0x3f0] sm:$0xff]  }
 0x84f   : > { %4727 = vmatprep.subr.bf16.mxu1 %v5100_v29  ;;  %v5137_v28 = vld [vmem:[%s6549_s10 + $0x330] sm:$0xff]  }
 0x850   : > { %v5138_v29 = vld [vmem:[%s6549_s10 + $0x3b0] sm:$0xff]  }
 0x851   : > { %4706 = vmatpush3.bf16.msra.mxu0 %v5101_v40  ;;  %v5139_v40 = vld [vmem:[%s6549_s10 + $0x378] sm:$0xff]  }
 0x852   : > { %4728 = vmatpush3.bf16.msra.mxu1 %v5102_v43  ;;  %4707 = vmatprep.subr.bf16.mxu0 %v5103_v44  ;;  %v5141_v43 = vld [vmem:[%s6549_s10 + $0x338] sm:$0xff]   ;;  %v2092_v44 = vmax.f32 %v5982_v1, 0.0  ;;  %v2099_v1 = vmax.f32 %v6044_v15, 0.0  ;;  %v5148_v15 = vld [vmem:[%s6549_s10 + $0x4c8] sm:$0xff]  }
 0x853   : > { %4729 = vmatprep.subr.bf16.mxu1 %v5104_v45  ;;  %v5142_v45 = vld [vmem:[%s6549_s10 + $0x3b8] sm:$0xff]  }
 0x854   : > { %v2123_v52 = vpack.c.bf16 %v2099_v1, %v2099_v1  ;;  %v5192_v1 = vld [vmem:[%s6549_s10 + $0x5e0] sm:$0xff]  }
 0x855   : > { %4708 = vmatpush3.bf16.msra.mxu0 %v5105_v49  ;;  %v5144_v49 = vld [vmem:[%s6549_s10 + $0x4c0] sm:$0xff]  }
 0x856   : > { %4730 = vmatpush3.bf16.msra.mxu1 %v5106_v51  ;;  %4709 = vmatprep.subr.bf16.mxu0 %v5107_v53  ;;  %v5145_v51 = vld [vmem:[%s6549_s10 + $0x400] sm:$0xff]   ;;  %v2116_v53 = vpack.c.bf16 %v2092_v44, %v2092_v44  ;;  %v5186_v44 = vld [vmem:[%s6549_s10 + $0x590] sm:$0xff]  }
 0x857   : > { %4731 = vmatprep.subr.bf16.mxu1 %v5108_v32  ;;  %v2118_v32 = vpack.c.bf16 %v2094_v47, %v2094_v47  ;;  %v5189_v47 = vld [vmem:[%s6549_s10 + $0x518] sm:$0xff]  }
 0x859   : > { %4710 = vmatpush3.bf16.msra.mxu0 %v5109_v39  ;;  %v5149_v39 = vld [vmem:[%s6549_s10 + $0x408] sm:$0xff]  }
 0x85a   : > { %4732 = vmatpush3.bf16.msra.mxu1 %v5110_v30  ;;  %4739 = vmatprep.subr.bf16.mxu0 %v5111_v56  ;;  %v5151_v30 = vld [vmem:[%s6549_s10 + $0x450] sm:$0xff]  }
 0x85b   : > { %4761 = vmatprep.subr.bf16.mxu1 %v5112_v27  ;;  %v5152_v56 = vld [vmem:[%s6549_s10 + $0x4d0] sm:$0xff]  }
 0x85c   : > { %3857 = vmatmul.mubr.bf16.vlgmr.msra.gmra.mrb[52].mxu0 %v2112_v48  ;;  %v5154_v27 = vld [vmem:[%s6549_s10 + $0x490] sm:$0xff]   ;;  %v5158_v48 = vld [vmem:[%s6549_s10 + $0x498] sm:$0xff]  }
 0x85d   : > { %3897 = vmatmul.mubr.bf16.vlgmr.msra.gmra.mrb[52].mxu1 %v2114_v41  ;;  %4740 = vmatpush3.bf16.msra.mxu0 %v5113_v31  ;;  %v5157_v31 = vld [vmem:[%s6549_s10 + $0x418] sm:$0xff]   ;;  %v5160_v41 = vld [vmem:[%s6549_s10 + $0x4e0] sm:$0xff]  }
 0x85e   : > { %3936 = vmatprep.mubr.bf16.mxu0 %v2117_v0  ;;  %4762 = vmatpush3.bf16.msra.mxu1 %v5114_v60  ;;  %v5159_v60 = vld [vmem:[%s6549_s10 + $0x460] sm:$0xff]  }
 0x85f   : > { %3976 = vmatprep.mubr.bf16.mxu1 %v2119_v3  ;;  %4741 = vmatprep.subr.bf16.mxu0 %v5115_v61  ;;  %v5161_v61 = vld [vmem:[%s6549_s10 + $0x420] sm:$0xff]   ;;  %v5164_v3 = vld [vmem:[%s6549_s10 + $0x4e8] sm:$0xff]  }
 0x860   : > { %4763 = vmatprep.subr.bf16.mxu1 %v5116_v2  ;;  %v5162_v0 = vld [vmem:[%s6549_s10 + $0x4a0] sm:$0xff]   ;;  %v5163_v2 = vld [vmem:[%s6549_s10 + $0x468] sm:$0xff]  }
 0x861   : > { %4742 = vmatpush3.bf16.msra.mxu0 %v5117_v5  ;;  %v5165_v5 = vld [vmem:[%s6549_s10 + $0x428] sm:$0xff]  }
 0x862   : > { %4764 = vmatpush3.bf16.msra.mxu1 %v5118_v8  ;;  %4743 = vmatprep.subr.bf16.mxu0 %v5119_v11  ;;  %v1291_v8 = vrot.slane %v6002_v33, %v5873_v34  ;;  %v5166_v11 = vld [vmem:[%s6549_s10 + $0x4a8] sm:$0xff]   ;;  %v5169_v34 = vld [vmem:[%s6549_s10 + $0x430] sm:$0xff]  }
 0x863   : > { %4765 = vmatprep.subr.bf16.mxu1 %v5120_v13  ;;  %v5167_v13 = vld [vmem:[%s6549_s10 + $0x470] sm:$0xff]  }
 0x864   : > { %v1951_v33 = vadd.f32 %v6038_v16, %v1291_v8  ;;  %v5173_v16 = vld [vmem:[%s6549_s10 + $0x438] sm:$0xff]  }
 0x865   : > { %4744 = vmatpush3.bf16.msra.mxu0 %v5121_v17  ;;  %v5168_v17 = vld [vmem:[%s6549_s10 + $0x4f0] sm:$0xff]  }
 0x866   : > { %4766 = vmatpush3.bf16.msra.mxu1 %v5122_v36  ;;  %4745 = vmatprep.subr.bf16.mxu0 %v5123_v18  ;;  %v5170_v36 = vld [vmem:[%s6549_s10 + $0x4b0] sm:$0xff]   ;;  %v5171_v18 = vld [vmem:[%s6549_s10 + $0x478] sm:$0xff]  }
 0x867   : > { %4767 = vmatprep.subr.bf16.mxu1 %v5124_v12  ;;  %v5172_v12 = vld [vmem:[%s6549_s10 + $0x4f8] sm:$0xff]  }
 0x869   : > { %4746 = vmatpush3.bf16.msra.mxu0 %v5125_v19  ;;  %v2096_v19 = vmax.f32 %v1951_v33, 0.0 }
 0x86a   : > { %4768 = vmatpush3.bf16.msra.mxu1 %v5126_v20  ;;  %4747 = vmatprep.subr.bf16.mxu0 %v5127_v14  ;;  %v5174_v20 = vld [vmem:[%s6549_s10 + $0x4b8] sm:$0xff]   ;;  %v5175_v14 = vld [vmem:[%s6549_s10 + $0x540] sm:$0xff]  }
 0x86b   : > { %4769 = vmatprep.subr.bf16.mxu1 %v5128_v35  ;;  %v2098_v35 = vmax.f32 %v6040_v24, 0.0  ;;  %v5178_v24 = vld [vmem:[%s6549_s10 + $0x580] sm:$0xff]  }
 0x86d   : > { %4748 = vmatpush3.bf16.msra.mxu0 %v5129_v37  ;;  %v5176_v37 = vld [vmem:[%s6549_s10 + $0x5c0] sm:$0xff]  }
 0x86e   : > { %4770 = vmatpush3.bf16.msra.mxu1 %v5130_v38  ;;  %4749 = vmatprep.subr.bf16.mxu0 %v5131_v21  ;;  %v2101_v38 = vmax.f32 %v6082_v9, 0.0  ;;  %v2103_v21 = vmax.f32 %v6084_v10, 0.0  ;;  %v5179_v9 = vld [vmem:[%s6549_s10 + $0x548] sm:$0xff]  }
 0x86f   : > { %4771 = vmatprep.subr.bf16.mxu1 %v5132_v22  ;;  %v5177_v22 = vld [vmem:[%s6549_s10 + $0x500] sm:$0xff]   ;;  %v5180_v10 = vld [vmem:[%s6549_s10 + $0x5c8] sm:$0xff]  }
 0x871   : > { %4750 = vmatpush3.bf16.msra.mxu0 %v5133_v23  ;;  %v2120_v23 = vpack.c.bf16 %v2096_v19, %v2096_v19 }
 0x872   : > { %4772 = vmatpush3.bf16.msra.mxu1 %v5134_v6  ;;  %4751 = vmatprep.subr.bf16.mxu0 %v5135_v25  ;;  %v2122_v6 = vpack.c.bf16 %v2098_v35, %v2098_v35  ;;  %v2125_v25 = vpack.c.bf16 %v2101_v38, %v2101_v38 }
 0x873   : > { %4773 = vmatprep.subr.bf16.mxu1 %v5136_v26  ;;  %v2127_v26 = vpack.c.bf16 %v2103_v21, %v2103_v21 }
 0x875   : > { %4752 = vmatpush3.bf16.msra.mxu0 %v5137_v28  ;;  %v5181_v28 = vld [vmem:[%s6549_s10 + $0x508] sm:$0xff]  }
 0x876   : > { %4774 = vmatpush3.bf16.msra.mxu1 %v5138_v29  ;;  %4753 = vmatprep.subr.bf16.mxu0 %v5139_v40  ;;  %v5182_v29 = vld [vmem:[%s6549_s10 + $0x588] sm:$0xff]   ;;  %v5183_v40 = vld [vmem:[%s6549_s10 + $0x550] sm:$0xff]  }
 0x877   : > { %4775 = vmatprep.subr.bf16.mxu1 %v5140_v42  ;;  %v5184_v42 = vld [vmem:[%s6549_s10 + $0x5d0] sm:$0xff]  }
 0x879   : > { %4754 = vmatpush3.bf16.msra.mxu0 %v5141_v43  ;;  %v5185_v43 = vld [vmem:[%s6549_s10 + $0x510] sm:$0xff]  }
 0x87a   : > { %4776 = vmatpush3.bf16.msra.mxu1 %v5142_v45  ;;  %4783 = vmatprep.subr.bf16.mxu0 %v5143_v46  ;;  %v5187_v45 = vld [vmem:[%s6549_s10 + $0x558] sm:$0xff]  }
 0x87b   : > { %4805 = vmatprep.subr.bf16.mxu1 %v5144_v49  ;;  %v5188_v46 = vld [vmem:[%s6549_s10 + $0x5d8] sm:$0xff]  }
 0x87c   : > { %3937 = vmatmul.mubr.bf16.vlgmr.msra.gmra.mrb[56].mxu0 %v2116_v53  ;;  %v5190_v49 = vld [vmem:[%s6549_s10 + $0x598] sm:$0xff]   ;;  %v5194_v53 = vld [vmem:[%s6549_s10 + $0x5a0] sm:$0xff]  }
 0x87d   : > { %3977 = vmatmul.mubr.bf16.vlgmr.msra.gmra.mrb[56].mxu1 %v2118_v32  ;;  %4784 = vmatpush3.bf16.msra.mxu0 %v5145_v51  ;;  %v5193_v51 = vld [vmem:[%s6549_s10 + $0x520] sm:$0xff]   ;;  %v5196_v32 = vld [vmem:[%s6549_s10 + $0x5e8] sm:$0xff]  }
 0x87e   : > { %4016 = vmatprep.mubr.bf16.mxu0 %v2121_v54  ;;  %4806 = vmatpush3.bf16.msra.mxu1 %v5146_v62  ;;  %v5195_v62 = vld [vmem:[%s6549_s10 + $0x568] sm:$0xff]  }
 0x87f   : > { %4056 = vmatprep.mubr.bf16.mxu1 %v2123_v52  ;;  %4785 = vmatprep.subr.bf16.mxu0 %v5147_v7  ;;  %v5197_v7 = vld [vmem:[%s6549_s10 + $0x528] sm:$0xff]   ;;  %v5200_v52 = vld [vmem:[%s6549_s10 + $0x5f0] sm:$0xff]  }
 0x880   : > { %4807 = vmatprep.subr.bf16.mxu1 %v5148_v15  ;;  %v5198_v54 = vld [vmem:[%s6549_s10 + $0x5a8] sm:$0xff]   ;;  %v5199_v15 = vld [vmem:[%s6549_s10 + $0x570] sm:$0xff]  }
 0x881   : > { %4786 = vmatpush3.bf16.msra.mxu0 %v5149_v39  ;;  %v5201_v39 = vld [vmem:[%s6549_s10 + $0x530] sm:$0xff]  }
 0x882   : > { %4808 = vmatpush3.bf16.msra.mxu1 %v5150_v55  ;;  %4787 = vmatprep.subr.bf16.mxu0 %v5151_v30  ;;  %v5202_v55 = vld [vmem:[%s6549_s10 + $0x5b0] sm:$0xff]   ;;  %v5203_v30 = vld [vmem:[%s6549_s10 + $0x578] sm:$0xff]  }
 0x883   : > { %4809 = vmatprep.subr.bf16.mxu1 %v5152_v56  ;;  %v5204_v56 = vld [vmem:[%s6549_s10 + $0x5f8] sm:$0xff]  }
 0x885   : > { %4788 = vmatpush3.bf16.msra.mxu0 %v5153_v63  ;;  %v5205_v63 = vld [vmem:[%s6549_s10 + $0x538] sm:$0xff]  }
 0x886   : > { %4810 = vmatpush3.bf16.msra.mxu1 %v5154_v27  ;;  %4789 = vmatprep.subr.bf16.mxu0 %v5155_v58  ;;  %v2100_v27 = vmax.f32 %v6078_v57, 0.0  ;;  %v5206_v58 = vld [vmem:[%s6549_s10 + $0x5b8] sm:$0xff]  }
 0x887   : > { %4811 = vmatprep.subr.bf16.mxu1 %v5156_v59  ;;  %v2102_v59 = vmax.f32 %v6080_v4, 0.0 }
 0x889   : > { %4790 = vmatpush3.bf16.msra.mxu0 %v5157_v31  ;;  %v2124_v31 = vpack.c.bf16 %v2100_v27, %v2100_v27 }
 0x88a   : > { %4812 = vmatpush3.bf16.msra.mxu1 %v5158_v48  ;;  %4791 = vmatprep.subr.bf16.mxu0 %v5159_v60  ;;  %v2126_v48 = vpack.c.bf16 %v2102_v59, %v2102_v59 }
 0x88b   : > { %4813 = vmatprep.subr.bf16.mxu1 %v5160_v41 }
 0x88d   : > { %4792 = vmatpush3.bf16.msra.mxu0 %v5161_v61 }
 0x88e   : > { %4814 = vmatpush3.bf16.msra.mxu1 %v5162_v0  ;;  %4793 = vmatprep.subr.bf16.mxu0 %v5163_v2 }
 0x88f   : > { %4815 = vmatprep.subr.bf16.mxu1 %v5164_v3 }
 0x891   : > { %4794 = vmatpush3.bf16.msra.mxu0 %v5165_v5 }
 0x892   : > { %4816 = vmatpush3.bf16.msra.mxu1 %v5166_v11  ;;  %4795 = vmatprep.subr.bf16.mxu0 %v5167_v13 }
 0x893   : > { %4817 = vmatprep.subr.bf16.mxu1 %v5168_v17 }
 0x895   : > { %4796 = vmatpush3.bf16.msra.mxu0 %v5169_v34 }
 0x896   : > { %4818 = vmatpush3.bf16.msra.mxu1 %v5170_v36  ;;  %4797 = vmatprep.subr.bf16.mxu0 %v5171_v18 }
 0x897   : > { %4819 = vmatprep.subr.bf16.mxu1 %v5172_v12 }
 0x899   : > { %4798 = vmatpush3.bf16.msra.mxu0 %v5173_v16 }
 0x89a   : > { %4820 = vmatpush3.bf16.msra.mxu1 %v5174_v20  ;;  %4827 = vmatprep.subr.bf16.mxu0 %v5175_v14 }
 0x89b   : > { %4849 = vmatprep.subr.bf16.mxu1 %v5176_v37 }
 0x89c   : > { %4017 = vmatmul.mubr.bf16.vlgmr.msra.gmra.mrb[60].mxu0 %v2120_v23 }
 0x89d   : > { %4057 = vmatmul.mubr.bf16.vlgmr.msra.gmra.mrb[60].mxu1 %v2122_v6  ;;  %4828 = vmatpush3.bf16.msra.mxu0 %v5177_v22 }
 0x89e   : > { %4096 = vmatprep.mubr.bf16.mxu0 %v2125_v25  ;;  %4850 = vmatpush3.bf16.msra.mxu1 %v5178_v24 }
 0x89f   : > { %4136 = vmatprep.mubr.bf16.mxu1 %v2127_v26  ;;  %4829 = vmatprep.subr.bf16.mxu0 %v5179_v9 }
 0x8a0   : > { %4851 = vmatprep.subr.bf16.mxu1 %v5180_v10 }
 0x8a1   : > { %4830 = vmatpush3.bf16.msra.mxu0 %v5181_v28 }
 0x8a2   : > { %4852 = vmatpush3.bf16.msra.mxu1 %v5182_v29  ;;  %4831 = vmatprep.subr.bf16.mxu0 %v5183_v40 }
 0x8a3   : > { %4853 = vmatprep.subr.bf16.mxu1 %v5184_v42 }
 0x8a5   : > { %4832 = vmatpush3.bf16.msra.mxu0 %v5185_v43 }
 0x8a6   : > { %4854 = vmatpush3.bf16.msra.mxu1 %v5186_v44  ;;  %4833 = vmatprep.subr.bf16.mxu0 %v5187_v45 }
 0x8a7   : > { %4855 = vmatprep.subr.bf16.mxu1 %v5188_v46 }
 0x8a9   : > { %4834 = vmatpush3.bf16.msra.mxu0 %v5189_v47 }
 0x8aa   : > { %4856 = vmatpush3.bf16.msra.mxu1 %v5190_v49  ;;  %4835 = vmatprep.subr.bf16.mxu0 %v5191_v50 }
 0x8ab   : > { %4857 = vmatprep.subr.bf16.mxu1 %v5192_v1 }
 0x8ad   : > { %4836 = vmatpush3.bf16.msra.mxu0 %v5193_v51 }
 0x8ae   : > { %4858 = vmatpush3.bf16.msra.mxu1 %v5194_v53  ;;  %4837 = vmatprep.subr.bf16.mxu0 %v5195_v62 }
 0x8af   : > { %4859 = vmatprep.subr.bf16.mxu1 %v5196_v32 }
 0x8b1   : > { %4838 = vmatpush3.bf16.msra.mxu0 %v5197_v7 }
 0x8b2   : > { %4860 = vmatpush3.bf16.msra.mxu1 %v5198_v54  ;;  %4839 = vmatprep.subr.bf16.mxu0 %v5199_v15 }
 0x8b3   : > { %4861 = vmatprep.subr.bf16.mxu1 %v5200_v52 }
 0x8b5   : > { %4840 = vmatpush3.bf16.msra.mxu0 %v5201_v39 }
 0x8b6   : > { %4862 = vmatpush3.bf16.msra.mxu1 %v5202_v55  ;;  %4841 = vmatprep.subr.bf16.mxu0 %v5203_v30 }
 0x8b7   : > { %4863 = vmatprep.subr.bf16.mxu1 %v5204_v56 }
 0x8b9   : > { %4842 = vmatpush3.bf16.msra.mxu0 %v5205_v63 }
 0x8ba   : > { %4864 = vmatpush3.bf16.msra.mxu1 %v5206_v58 }
 0x8bc   : > { %4097 = vmatmul.mubr.bf16.vlgmr.msra.gmra.mrb[64].mxu0 %v2124_v31 }
 0x8bd   : > { %4137 = vmatmul.mubr.bf16.vlgmr.msra.gmra.mrb[64].mxu1 %v2126_v48 }
 0x8ef   : > { %v4623_v60 = vpop.f32.mrb[44].mxu0  ;;  %v4645_v41 = vpop.f32.mrb[44].mxu1 }
 0x8f0   : > { %v4624_v61 = vpop.f32.mrb[45].mxu0  ;;  %v4646_v0 = vpop.f32.mrb[45].mxu1 }
 0x8f1   : > { %v4625_v57 = vadd.f32 %v4624_v61, %v4623_v60  ;;  %v4647_v2 = vadd.f32 %v4646_v0, %v4645_v41  ;;  %v4626_v3 = vpop.f32.mrb[46].mxu0  ;;  %v4648_v5 = vpop.f32.mrb[46].mxu1 }
 0x8f2   : > { %v4627_v8 = vpop.f32.mrb[47].mxu0  ;;  %v4649_v11 = vpop.f32.mrb[47].mxu1  ;;  %v4575_v5 = vld [vmem:[%s6550_s11] ss:$0 sm:$0xff] }
 0x8f3   : > { %v3739_v13 = vadd.f32 %v4647_v2, %v4625_v57 }
 0x90f   : > { %v4667_v17 = vpop.f32.mrb[48].mxu0  ;;  %v4689_v4 = vpop.f32.mrb[48].mxu1 }
 0x910   : > { %v4668_v34 = vpop.f32.mrb[49].mxu0  ;;  %v4690_v33 = vpop.f32.mrb[49].mxu1 }
 0x911   : > { %v4669_v36 = vadd.f32 %v4668_v34, %v4667_v17  ;;  %v4691_v18 = vadd.f32 %v4690_v33, %v4689_v4  ;;  %v4670_v12 = vpop.f32.mrb[50].mxu0  ;;  %v4692_v16 = vpop.f32.mrb[50].mxu1 }
 0x912   : > { %v4671_v19 = vpop.f32.mrb[51].mxu0  ;;  %v4693_v20 = vpop.f32.mrb[51].mxu1 }
 0x913   : > { %v3779_v14 = vadd.f32 %v4669_v36, %v3739_v13  ;;  %v4167_v13 = vld [vmem:[#allocation4] sm:$0xff] }
 0x915   : > { %v3819_v35 = vadd.f32 %v4691_v18, %v3779_v14 }
 0x92f   : > { %v4711_v37 = vpop.f32.mrb[52].mxu0 }
 0x930   : > { %v4733_v38 = vpop.f32.mrb[52].mxu1  ;;  %v4712_v21 = vpop.f32.mrb[53].mxu0 }
 0x931   : > { %v4713_v22 = vadd.f32 %v4712_v21, %v4711_v37  ;;  %v4734_v23 = vpop.f32.mrb[53].mxu1  ;;  %v4714_v24 = vpop.f32.mrb[54].mxu0 }
 0x932   : > { %v4735_v6 = vadd.f32 %v4734_v23, %v4733_v38  ;;  %v4736_v9 = vpop.f32.mrb[54].mxu1  ;;  %v4715_v25 = vpop.f32.mrb[55].mxu0  ;;  %v4577_v38 = vld [vmem:[%s6552_s13] ss:$0 sm:$0xff] }
 0x933   : > { %v3859_v10 = vadd.f32 %v4713_v22, %v3819_v35  ;;  %v4737_v26 = vpop.f32.mrb[55].mxu1  ;;  %v4576_v35 = vld [vmem:[%s6551_s12] ss:$0 sm:$0xff] }
 0x935   : > { %v3899_v28 = vadd.f32 %v4735_v6, %v3859_v10 }
 0x94f   : > { %v4755_v29 = vpop.f32.mrb[56].mxu0 }
 0x950   : > { %v4777_v40 = vpop.f32.mrb[56].mxu1  ;;  %v4756_v42 = vpop.f32.mrb[57].mxu0 }
 0x951   : > { %v4757_v43 = vadd.f32 %v4756_v42, %v4755_v29  ;;  %v4778_v44 = vpop.f32.mrb[57].mxu1  ;;  %v4758_v45 = vpop.f32.mrb[58].mxu0 }
 0x952   : > { %v4779_v46 = vadd.f32 %v4778_v44, %v4777_v40  ;;  %v4780_v47 = vpop.f32.mrb[58].mxu1  ;;  %v4759_v49 = vpop.f32.mrb[59].mxu0 }
 0x953   : > { %v3939_v50 = vadd.f32 %v4757_v43, %v3899_v28  ;;  %v4781_v1 = vpop.f32.mrb[59].mxu1 }
 0x955   : > { %v3979_v51 = vadd.f32 %v4779_v46, %v3939_v50 }
 0x96f   : > { %v4799_v53 = vpop.f32.mrb[60].mxu0 }
 0x970   : > { %v4821_v62 = vpop.f32.mrb[60].mxu1  ;;  %v4800_v32 = vpop.f32.mrb[61].mxu0 }
 0x971   : > { %v4801_v7 = vadd.f32 %v4800_v32, %v4799_v53  ;;  %v4822_v54 = vpop.f32.mrb[61].mxu1  ;;  %v4802_v15 = vpop.f32.mrb[62].mxu0 }
 0x972   : > { %v4823_v52 = vadd.f32 %v4822_v54, %v4821_v62  ;;  %v4824_v39 = vpop.f32.mrb[62].mxu1  ;;  %v4803_v55 = vpop.f32.mrb[63].mxu0 }
 0x973   : > { %v4019_v30 = vadd.f32 %v4801_v7, %v3979_v51  ;;  %v4825_v56 = vpop.f32.mrb[63].mxu1 }
 0x975   : > { %v4059_v63 = vadd.f32 %v4823_v52, %v4019_v30 }
 0x98f   : > { %v4843_v27 = vpop.f32.mrb[64].mxu0 }
 0x990   : > { %v4865_v58 = vpop.f32.mrb[64].mxu1  ;;  %v4844_v59 = vpop.f32.mrb[65].mxu0 }
 0x991   : > { %v4845_v31 = vadd.f32 %v4844_v59, %v4843_v27  ;;  %v4866_v48 = vpop.f32.mrb[65].mxu1  ;;  %v4846_v60 = vpop.f32.mrb[66].mxu0 }
 0x992   : > { %v4867_v41 = vadd.f32 %v4866_v48, %v4865_v58  ;;  %v4868_v61 = vpop.f32.mrb[66].mxu1  ;;  %v4847_v0 = vpop.f32.mrb[67].mxu0 }
 0x993   : > { %v4099_v57 = vadd.f32 %v4845_v31, %v4059_v63  ;;  %v4869_v2 = vpop.f32.mrb[67].mxu1 }
 0x995   : > { %v4139_v3 = vadd.f32 %v4867_v41, %v4099_v57 }
 0x997   : > { %4147 = vst.msk [vmem:[#allocation6] sm:$0xff] %vm520_vm1, %v4139_v3 }
 0x99e   : > { %v4158_v8 = vld [vmem:[#allocation6] sm:$0xff] }
 0x99f   : > { %v4166_v11 = vadd.f32 %v4575_v5, %v4158_v8 }
 0x9a1   : > { %v4168_v17 = vadd.f32 %v4167_v13, %v4166_v11 }
 0x9a3   : > { %v4171_v4 = vsel %vm520_vm1, %v4168_v17, 0.0 }
 0x9a4   : > { %4172 = vadd.xlane.f32.xlu0 %v4171_v4 }
 0xa31   : > { %v4173_v34 = vpop.xlane.xlu0 %4172 }
 0xa32   : > { %v4175_v33 = vmul.f32 0.03125, %v4173_v34 }
 0xa34   : > { %v4176_v36 = vsub.f32 %v4168_v17, %v4175_v33 }
 0xa36   : > { %v4177_v18 = vmul.f32 %v4176_v36, %v4176_v36 }
 0xa38   : > { %v4178_v12 = vsel %vm520_vm1, %v4177_v18, 0.0 }
 0xa39   : > { %4179 = vadd.xlane.f32.xlu0 %v4178_v12 }
 0xac6   : > { %v4180_v16 = vpop.xlane.xlu0 %4179 }
 0xac7   : > { %v4181_v19 = vmul.f32 0.03125, %v4180_v16 }
 0xac9   : > { %v4182_v20 = vadd.f32 1e-12, %v4181_v19 }
 0xacb   : > { %5225 = vrsqrt.f32 %v4182_v20 }
 0xad5   : > { %v5226_v14 = vpop.eup %5225 }
 0xad6   : > { %v4184_v37 = vmul.f32 %v5226_v14, %v4176_v36 }
 0xad8   : > { %v4191_v21 = vmul.f32 %v4576_v35, %v4184_v37 }
 0xada   : > { %v4198_v22 = vadd.f32 %v4577_v38, %v4191_v21 }
 0xadc   : > { %4199 = vst.msk [vmem:[%s481_s27] sm:$0xff] %vm520_vm1, %v4198_v22 }
 0xadd   : > { %5241 = shalt.err (!%p5238_p5)
}
 0xade   : > { %s5242_s4 = scalar_lea.hbm %s6491_s5, 128  ;;  %s5246_s0 = scalar_lea.hbm %s6553_s14, 256 }
 0xadf   : > { %p5243_p6 = scmp.ne.s32.totalorder %s6491_s5, %s5242_s4  ;;  %p5247_p10 = scmp.lt.u32.totalorder %s6491_s5, %s6553_s14 }
 0xae0   : > { %p5248_p11 = scmp.lt.u32.totalorder %s5246_s0, %s5242_s4  ;;  %p5250_p13 = scmp.lt.u32.totalorder %s5242_s4, %s6491_s5 }
 0xae1   : > { %p5244_p7 = pnand %p5243_p6, %p5441_p4 }
 0xae2   : > { %p5249_p12 = por %p5248_p11, %p5247_p10 }
 0xae3   : > { %p5245_p9 = pneg %p5244_p7 }
 0xae4   : > { %p5251_p0 = por %p5250_p13, %p5249_p12 }
 0xae6   : > { %p5252_p1 = pnand %p5251_p0, %p5245_p9 }
 0xae8   : > { %5255 = shalt.err (!%p5252_p1)
}
 0xae9   : > { %4935 = dma.vmem_to_hbm [thread:$0]  (%p5441_p4), %s6493_s2, 128, %s6491_s5, %s4201_s19  }
 0xaea PF: > { %p4941_p2 = scmp.ge.s32.totalorder %s5306_s18, 2  ;;  %s4226_s24 = sand.u32 1, %s5286_s29  }
 0xaeb   : > { %s4227_s16 = scalar_lea.sflag [#allocation8], %s4226_s24 }
 0xaec   : > { %p4938_p3 = pnand %p4941_p2, %p5448_p8 }
 0xaee   : > { %5281 = dma.done.wait (!%p4938_p3), %s4227_s16, 128  }
 0xaef   : > { %5283 = vsyncadd (!%p4938_p3), %s4227_s16, 4294967168  ;;  %s27_s18 = sadd.s32 1, %s5306_s18   ;;  %s6568_s29 = smov %s5290_s30 }
 0xaf0   : > { %p24_p5 = scmp.ge.s32.totalorder %s27_s18, 4   ;;  %s6569_s30 = smov %s5294_s15 }
 0xaf1   : > { %s6570_s15 = smov %s5454_s26  ;;  %s6571_s16 = smov %s5302_s17 }
 0xaf2   : > { %s6572_s17 = smov %s6574_s21  ;;  %26 = sbr.rel (!%p24_p5) target bundleno = 11 (0xb), region = 130 }
 0xaf9   :  { %4232 = vsyncpa [#allocation8], 1 }
 0xafa   :  { %4234 = vsyncpa [#allocation8 + $0x1], 1 }

</bundles_post_ra>
